<compile_context>
chip_gen: v6e
topology: v6e:2x2x1
jax: 0.10.0
libtpu: 0.0.40
codegen_flags: <defaults>
</compile_context>

<pallas_src>
import math
import jax
import jax.numpy as jnp
from jax.experimental import pallas as pl
from jax.experimental.pallas import tpu as pltpu

# ---------------- problem configuration (small, consistent with the module) ----------------
B = 2           # batch
T = 16          # time (sequence length)
C = 32          # in_channels (n_feat)
H = 4           # n_head
DK = C // H     # d_k
BT = B * T
BH = B * H
EPS = 1e-5      # LayerNorm eps (PyTorch default)
LAYER_SCALE_INIT = 1e-5
MASK_NEG = -1e30
INV_SQRT_DK = 1.0 / math.sqrt(DK)


def mha_kernel(x_ref, posk_ref, bias_ref, wqkv_ref, bqkv_ref, wo_ref, bo_ref, o_ref):
    # ---- whole problem in one invocation: fold batch into the row dim ----
    x = x_ref[...].reshape(BT, C)                                   # (B*T, C)

    # ---- LayerNorm statistics (gamma/beta folded into wqkv/bqkv host-side) ----
    mean = jnp.mean(x, axis=-1, keepdims=True)
    xc = x - mean
    var = jnp.mean(xc * xc, axis=-1, keepdims=True)
    xn = xc * jax.lax.rsqrt(var + EPS)

    # ---- fused Q/K/V projection: one (B*T, C) @ (C, 3C) MXU matmul ----
    qkv = jnp.dot(xn, wqkv_ref[...],
                  preferred_element_type=jnp.float32) + bqkv_ref[...]   # (B*T, 3C)

    # ---- head-major q/k/v: ONE transpose covers q, k and v ----
    qkv_h = qkv.reshape(B, T, 3 * H, DK).transpose(0, 2, 1, 3)      # (B, 3H, T, DK)
    q_h = qkv_h[:, 0:H].reshape(BH, T, DK)                          # (B*H, T, DK)
    k_h = qkv_h[:, H:2 * H].reshape(BH, T, DK)
    v_h = qkv_h[:, 2 * H:3 * H].reshape(BH, T, DK)

    # ---- content scores, batched over fused (B*H): natural dot_general order ----
    a_scores = jnp.einsum('ctd,csd->cts', q_h, k_h,
                          preferred_element_type=jnp.float32)       # (B*H, T, S)

    # ---- relative-position scores, batched over fused (B*T) rows ----
    # pos_k is pre-tiled over batch host-side; q block is the first C lanes of qkv.
    q_t = qkv[:, :C].reshape(BT, H, DK)                             # (B*T, H, DK) time-major
    b_t = jnp.einsum('ihd,isd->ihs', q_t, posk_ref[...],
                     preferred_element_type=jnp.float32)            # (B*T, H, S)
    b_scores = b_t.reshape(B, T, H, T).transpose(0, 2, 1, 3).reshape(BH, T, T)

    # ---- scaled scores + additive mask bias (0 / -1e30, pre-broadcast over heads) ----
    bias = bias_ref[...]                                            # (B*H, T, S)
    scores = (a_scores + b_scores) * INV_SQRT_DK + bias

    # ---- numerically stable softmax over keys; reciprocal on the EUP slot ----
    m = jnp.max(scores, axis=-1, keepdims=True)
    e = jnp.exp(scores - m)
    s = jnp.sum(e, axis=-1, keepdims=True)
    attn = e * pl.reciprocal(s, approx=True)
    # Match PyTorch's post-softmax masked_fill (only changes fully-masked query rows).
    attn = jnp.where(bias < 0.0, 0.0, attn)

    # ---- context, batched over fused (B*H) ----
    ctx = jnp.einsum('cts,csd->ctd', attn, v_h,
                     preferred_element_type=jnp.float32)            # (B*H, T, DK)
    # back to (B*T, C) with channel = h*DK + d (matches PyTorch .transpose(1,2).view)
    ctx = ctx.reshape(B, H, T, DK).transpose(0, 2, 1, 3).reshape(BT, C)

    # ---- output projection (LayerScale folded into wo/bo host-side) ----
    y = jnp.dot(ctx, wo_ref[...], preferred_element_type=jnp.float32) + bo_ref[...]
    o_ref[...] = y.reshape(B, T, C).astype(o_ref.dtype)


def multi_head_attention(x, pos_k, mask, params):
    """x: (B, T, C) f32, pos_k: (T, T, DK) f32, mask: (B, T, T) f32 (1=keep, 0=mask)."""
    (gamma, beta, wq, bq, wk, bk, wv, bv, wo, bo, ls) = params

    # ---- host-side weight prep: fuse QKV, pre-transpose, fold LN affine + LayerScale ----
    wqkv_cat = jnp.concatenate([wq.T, wk.T, wv.T], axis=1)          # (C, 3C)
    bqkv_cat = jnp.concatenate([bq, bk, bv])                        # (3C,)
    wqkv_f = gamma[:, None] * wqkv_cat                              # LN gamma folded into rows
    bqkv_f = (beta @ wqkv_cat + bqkv_cat).reshape(1, 3 * C)         # LN beta folded into bias
    wo_f = wo.T * ls[None, :]                                       # LayerScale folded into Wo
    bo_f = (bo * ls).reshape(1, C)

    # ---- host-side operand prep ----
    posk_b = jnp.tile(pos_k, (B, 1, 1))                             # (B*T, T, DK): row (b,t) -> pos_k[t]
    bias = jnp.where(mask == 0.0, MASK_NEG, 0.0).astype(jnp.float32)        # (B, T, T)
    bias = jnp.broadcast_to(bias[:, None], (B, H, T, T)).reshape(BH, T, T)  # broadcast over heads

    vmem = lambda: pl.BlockSpec(memory_space=pltpu.MemorySpace.VMEM)
    return pl.pallas_call(
        mha_kernel,
        out_shape=jax.ShapeDtypeStruct((B, T, C), jnp.float32),
        in_specs=[vmem() for _ in range(7)],
        out_specs=vmem(),
    )(x, posk_b, bias, wqkv_f, bqkv_f, wo_f, bo_f)


def mha_reference(x, pos_k, mask, params):
    """Pure-JAX reference mirroring the PyTorch module (inference mode)."""
    (gamma, beta, wq, bq, wk, bk, wv, bv, wo, bo, ls) = params
    mean = jnp.mean(x, -1, keepdims=True)
    var = jnp.mean((x - mean) ** 2, -1, keepdims=True)
    xn = (x - mean) / jnp.sqrt(var + EPS) * gamma + beta
    q = (xn @ wq.T + bq).reshape(B, T, H, DK).transpose(0, 2, 1, 3)
    k = (xn @ wk.T + bk).reshape(B, T, H, DK).transpose(0, 2, 1, 3)
    v = (xn @ wv.T + bv).reshape(B, T, H, DK).transpose(0, 2, 1, 3)
    a = jnp.einsum('bhtd,bhsd->bhts', q, k)
    b = jnp.einsum('bhtd,tsd->bhts', q, pos_k)
    scores = (a + b) / math.sqrt(DK)
    neg = (mask == 0.0)[:, None]
    scores = jnp.where(neg, float(jnp.finfo(jnp.float32).min), scores)
    attn = jax.nn.softmax(scores, axis=-1)
    attn = jnp.where(neg, 0.0, attn)
    ctx = jnp.einsum('bhts,bhsd->bhtd', attn, v).transpose(0, 2, 1, 3).reshape(B, T, C)
    return (ctx @ wo.T + bo) * ls


def init_params(key):
    keys = jax.random.split(key, 8)
    scale = 1.0 / math.sqrt(C)
    gamma = jnp.ones((C,), jnp.float32)
    beta = jnp.zeros((C,), jnp.float32)
    wq = jax.random.uniform(keys[0], (C, C), jnp.float32, -scale, scale)
    bq = jax.random.uniform(keys[1], (C,), jnp.float32, -scale, scale)
    wk = jax.random.uniform(keys[2], (C, C), jnp.float32, -scale, scale)
    bk = jax.random.uniform(keys[3], (C,), jnp.float32, -scale, scale)
    wv = jax.random.uniform(keys[4], (C, C), jnp.float32, -scale, scale)
    bv = jax.random.uniform(keys[5], (C,), jnp.float32, -scale, scale)
    wo = jax.random.uniform(keys[6], (C, C), jnp.float32, -scale, scale)
    bo = jax.random.uniform(keys[7], (C,), jnp.float32, -scale, scale)
    ls = jnp.full((C,), LAYER_SCALE_INIT, jnp.float32)
    return (gamma, beta, wq, bq, wk, bk, wv, bv, wo, bo, ls)


if __name__ == "__main__":
    key = jax.random.PRNGKey(0)
    k_x, k_p, k_params = jax.random.split(key, 3)

    x = jax.random.normal(k_x, (B, T, C), jnp.float32)
    pos_k = jax.random.normal(k_p, (T, T, DK), jnp.float32)
    # causal-style mask: 1 = attend, 0 = masked
    mask = jnp.tril(jnp.ones((T, T), jnp.float32))[None].repeat(B, axis=0)

    params = init_params(k_params)

    out = multi_head_attention(x, pos_k, mask, params)
    jax.block_until_ready(out)
    assert out.shape == (B, T, C)
    assert bool(jnp.all(jnp.isfinite(out)))

    # sanity check against the pure-JAX reference (loose tol: approx reciprocal + folding)
    ref = mha_reference(x, pos_k, mask, params)
    err = float(jnp.max(jnp.abs(out - ref)))
    ref_scale = float(jnp.max(jnp.abs(ref))) + 1e-12
    assert err <= 3e-2 * ref_scale + 1e-8, f"max abs err {err} vs ref scale {ref_scale}"

    print("KERNEL_OK")
</pallas_src>

<mosaic_0001>
module attributes {stable_mosaic.version = 11 : i64} {
  func.func @mha_kernel(%arg0: memref<2x16x32xf32, #tpu.memory_space<vmem>>, %arg1: memref<32x16x8xf32, #tpu.memory_space<vmem>>, %arg2: memref<8x16x16xf32, #tpu.memory_space<vmem>>, %arg3: memref<32x96xf32, #tpu.memory_space<vmem>>, %arg4: memref<1x96xf32, #tpu.memory_space<vmem>>, %arg5: memref<32x32xf32, #tpu.memory_space<vmem>>, %arg6: memref<1x32xf32, #tpu.memory_space<vmem>>, %arg7: memref<2x16x32xf32, #tpu.memory_space<vmem>>) attributes {dimension_semantics = [], scalar_prefetch = 0 : i64, scratch_operands = 0 : i64, tpu.core_type = #tpu.core_type<tc>} {
    %c0 = arith.constant 0 : index
    %c0_0 = arith.constant 0 : index
    %c0_1 = arith.constant 0 : index
    %0 = vector.load %arg0[%c0, %c0_0, %c0_1] : memref<2x16x32xf32, #tpu.memory_space<vmem>>, vector<2x16x32xf32>
    %1 = vector.shape_cast %0 : vector<2x16x32xf32> to vector<32x32xf32>
    %cst = arith.constant dense<0.000000e+00> : vector<32xf32>
    %2 = vector.multi_reduction <add>, %1, %cst [1] : vector<32x32xf32> to vector<32xf32>
    %3 = vector.shape_cast %2 : vector<32xf32> to vector<32x1xf32>
    %cst_2 = arith.constant 3.200000e+01 : f32
    %4 = vector.broadcast %cst_2 : f32 to vector<32x1xf32>
    %5 = arith.divf %3, %4 : vector<32x1xf32>
    %6 = vector.broadcast %5 : vector<32x1xf32> to vector<32x32xf32>
    %7 = arith.subf %1, %6 : vector<32x32xf32>
    %8 = arith.mulf %7, %7 : vector<32x32xf32>
    %cst_3 = arith.constant dense<0.000000e+00> : vector<32xf32>
    %9 = vector.multi_reduction <add>, %8, %cst_3 [1] : vector<32x32xf32> to vector<32xf32>
    %10 = vector.shape_cast %9 : vector<32xf32> to vector<32x1xf32>
    %cst_4 = arith.constant 3.200000e+01 : f32
    %11 = vector.broadcast %cst_4 : f32 to vector<32x1xf32>
    %12 = arith.divf %10, %11 : vector<32x1xf32>
    %cst_5 = arith.constant 9.99999974E-6 : f32
    %13 = vector.broadcast %cst_5 : f32 to vector<32x1xf32>
    %14 = arith.addf %12, %13 : vector<32x1xf32>
    %15 = math.rsqrt %14 : vector<32x1xf32>
    %16 = vector.broadcast %15 : vector<32x1xf32> to vector<32x32xf32>
    %17 = arith.mulf %7, %16 : vector<32x32xf32>
    %c0_6 = arith.constant 0 : index
    %c0_7 = arith.constant 0 : index
    %18 = vector.load %arg3[%c0_6, %c0_7] : memref<32x96xf32, #tpu.memory_space<vmem>>, vector<32x96xf32>
    %cst_8 = arith.constant dense<0.000000e+00> : vector<32x96xf32>
    %19 = tpu.matmul %17, %18, %cst_8 {dimension_numbers = #tpu.dot_dimension_numbers<[1], [0], [0], [1], [0, 0, 1, 1], [], []>} : vector<32x32xf32>, vector<32x96xf32>, vector<32x96xf32> -> vector<32x96xf32>
    %c0_9 = arith.constant 0 : index
    %c0_10 = arith.constant 0 : index
    %20 = vector.load %arg4[%c0_9, %c0_10] : memref<1x96xf32, #tpu.memory_space<vmem>>, vector<1x96xf32>
    %21 = vector.broadcast %20 : vector<1x96xf32> to vector<32x96xf32>
    %22 = arith.addf %19, %21 : vector<32x96xf32>
    %23 = vector.shape_cast %22 : vector<32x96xf32> to vector<2x16x12x8xf32>
    %24 = tpu.transpose %23, [0, 2, 1, 3] : vector<2x16x12x8xf32> -> vector<2x12x16x8xf32>
    %25 = vector.extract_strided_slice %24 {offsets = [0, 0, 0, 0], sizes = [2, 4, 16, 8], strides = [1, 1, 1, 1]} : vector<2x12x16x8xf32> to vector<2x4x16x8xf32>
    %26 = vector.shape_cast %25 : vector<2x4x16x8xf32> to vector<8x16x8xf32>
    %27 = vector.extract_strided_slice %24 {offsets = [0, 4, 0, 0], sizes = [2, 4, 16, 8], strides = [1, 1, 1, 1]} : vector<2x12x16x8xf32> to vector<2x4x16x8xf32>
    %28 = vector.shape_cast %27 : vector<2x4x16x8xf32> to vector<8x16x8xf32>
    %29 = vector.extract_strided_slice %24 {offsets = [0, 8, 0, 0], sizes = [2, 4, 16, 8], strides = [1, 1, 1, 1]} : vector<2x12x16x8xf32> to vector<2x4x16x8xf32>
    %30 = vector.shape_cast %29 : vector<2x4x16x8xf32> to vector<8x16x8xf32>
    "tpu.trace_start"() <{level = 10 : i32, message = "ctd,csd->cts"}> : () -> ()
    %cst_11 = arith.constant dense<0.000000e+00> : vector<8x16x16xf32>
    %31 = tpu.matmul %26, %28, %cst_11 {dimension_numbers = #tpu.dot_dimension_numbers<[2], [2], [1], [1], [0, 0, 0, 1, 1, 1], [0], [0]>} : vector<8x16x8xf32>, vector<8x16x8xf32>, vector<8x16x16xf32> -> vector<8x16x16xf32>
    "tpu.trace_stop"() : () -> ()
    %32 = vector.extract_strided_slice %22 {offsets = [0, 0], sizes = [32, 32], strides = [1, 1]} : vector<32x96xf32> to vector<32x32xf32>
    %33 = vector.shape_cast %32 : vector<32x32xf32> to vector<32x4x8xf32>
    %c0_12 = arith.constant 0 : index
    %c0_13 = arith.constant 0 : index
    %c0_14 = arith.constant 0 : index
    %34 = vector.load %arg1[%c0_12, %c0_13, %c0_14] : memref<32x16x8xf32, #tpu.memory_space<vmem>>, vector<32x16x8xf32>
    "tpu.trace_start"() <{level = 10 : i32, message = "ihd,isd->ihs"}> : () -> ()
    %cst_15 = arith.constant dense<0.000000e+00> : vector<32x4x16xf32>
    %35 = tpu.matmul %33, %34, %cst_15 {dimension_numbers = #tpu.dot_dimension_numbers<[2], [2], [1], [1], [0, 0, 0, 1, 1, 1], [0], [0]>} : vector<32x4x8xf32>, vector<32x16x8xf32>, vector<32x4x16xf32> -> vector<32x4x16xf32>
    "tpu.trace_stop"() : () -> ()
    %36 = vector.shape_cast %35 : vector<32x4x16xf32> to vector<2x16x4x16xf32>
    %37 = tpu.transpose %36, [0, 2, 1, 3] : vector<2x16x4x16xf32> -> vector<2x4x16x16xf32>
    %38 = vector.shape_cast %37 : vector<2x4x16x16xf32> to vector<8x16x16xf32>
    %c0_16 = arith.constant 0 : index
    %c0_17 = arith.constant 0 : index
    %c0_18 = arith.constant 0 : index
    %39 = vector.load %arg2[%c0_16, %c0_17, %c0_18] : memref<8x16x16xf32, #tpu.memory_space<vmem>>, vector<8x16x16xf32>
    %40 = arith.addf %31, %38 : vector<8x16x16xf32>
    %cst_19 = arith.constant 0.353553385 : f32
    %41 = vector.broadcast %cst_19 : f32 to vector<8x16x16xf32>
    %42 = arith.mulf %40, %41 : vector<8x16x16xf32>
    %43 = arith.addf %42, %39 : vector<8x16x16xf32>
    %cst_20 = arith.constant dense<0xFF800000> : vector<8x16xf32>
    %44 = vector.multi_reduction <maximumf>, %43, %cst_20 [2] : vector<8x16x16xf32> to vector<8x16xf32>
    %45 = vector.shape_cast %44 : vector<8x16xf32> to vector<8x16x1xf32>
    %46 = vector.broadcast %45 : vector<8x16x1xf32> to vector<8x16x16xf32>
    %47 = arith.subf %43, %46 : vector<8x16x16xf32>
    %48 = math.exp %47 : vector<8x16x16xf32>
    %cst_21 = arith.constant dense<0.000000e+00> : vector<8x16xf32>
    %49 = vector.multi_reduction <add>, %48, %cst_21 [2] : vector<8x16x16xf32> to vector<8x16xf32>
    %50 = vector.shape_cast %49 : vector<8x16xf32> to vector<8x16x1xf32>
    %51 = tpu.reciprocal %50 {approx = true} : vector<8x16x1xf32> -> vector<8x16x1xf32>
    %52 = vector.broadcast %51 : vector<8x16x1xf32> to vector<8x16x16xf32>
    %53 = arith.mulf %48, %52 : vector<8x16x16xf32>
    %cst_22 = arith.constant 0.000000e+00 : f32
    %54 = vector.broadcast %cst_22 : f32 to vector<8x16x16xf32>
    %55 = arith.cmpf olt, %39, %54 : vector<8x16x16xf32>
    %cst_23 = arith.constant 0.000000e+00 : f32
    %56 = vector.broadcast %cst_23 : f32 to vector<8x16x16xf32>
    %57 = arith.select %55, %56, %53 : vector<8x16x16xi1>, vector<8x16x16xf32>
    "tpu.trace_start"() <{level = 10 : i32, message = "cts,csd->ctd"}> : () -> ()
    %cst_24 = arith.constant dense<0.000000e+00> : vector<8x16x8xf32>
    %58 = tpu.matmul %57, %30, %cst_24 {dimension_numbers = #tpu.dot_dimension_numbers<[2], [1], [1], [2], [0, 0, 0, 1, 1, 2], [0], [0]>} : vector<8x16x16xf32>, vector<8x16x8xf32>, vector<8x16x8xf32> -> vector<8x16x8xf32>
    "tpu.trace_stop"() : () -> ()
    %59 = vector.shape_cast %58 : vector<8x16x8xf32> to vector<2x4x16x8xf32>
    %60 = tpu.transpose %59, [0, 2, 1, 3] : vector<2x4x16x8xf32> -> vector<2x16x4x8xf32>
    %61 = vector.shape_cast %60 : vector<2x16x4x8xf32> to vector<32x32xf32>
    %c0_25 = arith.constant 0 : index
    %c0_26 = arith.constant 0 : index
    %62 = vector.load %arg5[%c0_25, %c0_26] : memref<32x32xf32, #tpu.memory_space<vmem>>, vector<32x32xf32>
    %cst_27 = arith.constant dense<0.000000e+00> : vector<32x32xf32>
    %63 = tpu.matmul %61, %62, %cst_27 {dimension_numbers = #tpu.dot_dimension_numbers<[1], [0], [0], [1], [0, 0, 1, 1], [], []>} : vector<32x32xf32>, vector<32x32xf32>, vector<32x32xf32> -> vector<32x32xf32>
    %c0_28 = arith.constant 0 : index
    %c0_29 = arith.constant 0 : index
    %64 = vector.load %arg6[%c0_28, %c0_29] : memref<1x32xf32, #tpu.memory_space<vmem>>, vector<1x32xf32>
    %65 = vector.broadcast %64 : vector<1x32xf32> to vector<32x32xf32>
    %66 = arith.addf %63, %65 : vector<32x32xf32>
    %67 = vector.shape_cast %66 : vector<32x32xf32> to vector<2x16x32xf32>
    %c0_30 = arith.constant 0 : index
    %c0_31 = arith.constant 0 : index
    %c0_32 = arith.constant 0 : index
    %68 = vector.load %arg7[%c0_30, %c0_31, %c0_32] : memref<2x16x32xf32, #tpu.memory_space<vmem>>, vector<2x16x32xf32>
    tpu.vector_store %arg7[%c0_30, %c0_31, %c0_32], %67 {strides = array<i32>} : memref<2x16x32xf32, #tpu.memory_space<vmem>>, vector<2x16x32xf32>,
    return
  }
}

</mosaic_0001>

<bundles_post_ra>
// kernel: tpu_custom_call.1
= control target key start
LH: loop header
LB: loop body
LE: loop exit
PB: predicated region body
PF: predicated region fallthrough
CT: control target
= control target key end

     0   :  { %vm31_vm0 = vcmask 261120   ;;  %s10019_s0 = inlined_call_operand.vmem [shape: f32[2,16,32], index: 0, kind: input, shape index: {}]   ;;  %s10020_s1 = inlined_call_operand.vmem [shape: f32[32,16,8], index: 1, kind: input, shape index: {}]   ;;  %s10021_s2 = inlined_call_operand.vmem [shape: f32[8,16,16], index: 2, kind: input, shape index: {}]   ;;  %s10022_s3 = inlined_call_operand.vmem [shape: f32[32,96], index: 3, kind: input, shape index: {}]   ;;  %s10023_s4 = inlined_call_operand.vmem [shape: f32[1,96], index: 4, kind: input, shape index: {}]   ;;  %s10024_s5 = inlined_call_operand.vmem [shape: f32[32,32], index: 5, kind: input, shape index: {}]   ;;  %s10025_s6 = inlined_call_operand.vmem [shape: f32[1,32], index: 6, kind: input, shape index: {}]   ;;  %s10026_s7 = inlined_call_operand.hbm [shape: f32[2,16,32], index: 7, kind: output, shape index: {}]  }
   0x1   :  { %v27_v0 = vld [vmem:[%s10019_s0] sm:$0xff]  ;;  %v29_v1 = vld [vmem:[%s10019_s0 + $0x10] sm:$0xff]  ;;  %v28_v2 = vld [vmem:[%s10019_s0 + $0x8] sm:$0xff] }
   0x2   :  { %v32_v3 = vsel %vm31_vm0, %v27_v0, 0.0  ;;  %v38_v4 = vsel %vm31_vm0, %v29_v1, 0.0  ;;  %v30_v5 = vld [vmem:[%s10019_s0 + $0x18] sm:$0xff] }
   0x3   :  { %12 = vsyncpa [#allocation3], 0  ;;  %33 = vadd.xlane.f32.xlu0 %v32_v3  ;;  %39 = vadd.xlane.f32.xlu1 %v38_v4  ;;  %v35_v6 = vsel %vm31_vm0, %v28_v2, 0.0  ;;  %v41_v7 = vsel %vm31_vm0, %v30_v5, 0.0  ;;  %v88_v28 = vld [vmem:[%s10022_s3 + $0x18] sm:$0xff]  ;;  %v87_v29 = vld [vmem:[%s10022_s3 + $0x10] sm:$0xff]  ;;  %v334_v4 = vlaneseq }
   0x4   :  { %7554 = vmatprep.subr.mxu1 %v88_v28  ;;  %v86_v30 = vld [vmem:[%s10022_s3 + $0x8] sm:$0xff]  ;;  %v85_v31 = vld [vmem:[%s10022_s3] sm:$0xff]  ;;  %v10029_v52 = vmov 0.0   ;;  %vm2041_vm1 = vcmask 64512   ;;  %v1980_v54 = vld [vmem:[%s10020_s1 + $0x18] sm:$0xff]  ;;  %vm8033_vm2 = vmmov 0  }
   0x5   :  { %7555 = vmatpush3.msra.mxu1 %v88_v28  ;;  %7575 = vmatprep.subr.mxu0 %v10029_v52  ;;  %v1978_v53 = vld [vmem:[%s10020_s1 + $0x8] sm:$0xff]  ;;  %v1977_v56 = vld [vmem:[%s10020_s1] sm:$0xff]  ;;  %v1979_v59 = vld [vmem:[%s10020_s1 + $0x10] sm:$0xff]  ;;  %s8035_s25 = smov 120   ;;  %s8036_s26 = smov 104   ;;  %vm5586_vm3 = vcmask 130048  }
   0x6   :  { %7556 = vmatprep.subr.mxu1 %v87_v29  ;;  %7576 = vmatpush3.xpose.msk.msra.mxu0 %vm2041_vm1, %v1980_v54  ;;  %v7176_v57 = vld [vmem:[%s10023_s4] ss:$0 sm:$0xff]  ;;  %s8034_s4 = smov 112   ;;  %s8037_s27 = smov 96  }
   0x7   :  { %36 = vadd.xlane.f32.xlu0 %v35_v6  ;;  %42 = vadd.xlane.f32.xlu1 %v41_v7  ;;  %s8038_s28 = smov 80   ;;  %s8039_s29 = smov 88  }
   0x8   :  { %7557 = vmatpush3.msra.mxu1 %v87_v29  ;;  %7577 = vmatprep.subr.mxu0 %v10029_v52  ;;  %s8040_s30 = smov 72   ;;  %s8041_s8 = smov 64  }
   0x9   :  { %7558 = vmatprep.subr.mxu1 %v86_v30  ;;  %7579 = vmatprep.mubr.msk.f32.mxu0 %vm8033_vm2, %v10029_v52  ;;  %s8042_s0 = smov 56   ;;  %s8043_s9 = smov 48  }
   0xa   :  { %7559 = vmatpush3.msra.mxu1 %v86_v30  ;;  %7578 = vmatpush3.xpose.msk.msra.mxu0 %vm2041_vm1, %v1979_v59  ;;  %s8044_s10 = smov 40   ;;  %s8049_s11 = smov 24  }
   0xb   :  { %7560 = vmatprep.subr.mxu1 %v85_v31  ;;  %7589 = vmatprep.subr.mxu0 %v10029_v52  ;;  %s8050_s14 = smov [#allocation2]  }
   0xc   :  { %7561 = vmatpush3.msra.mxu1 %v85_v31  ;;  %v1982_v31 = vld [vmem:[%s10020_s1 + $0x28] sm:$0xff]  ;;  %s7165_s15 = sshll.u32 %s8050_s14, 4  ;;  %s7166_s15 = int_to_ptr.vmem [resolvable:$true] %s7165_s15 }
   0xd   :  { %7568 = vmatprep.subr.mxu1 %v10029_v52  ;;  %p8015_p1 = scmp.lt.s32.totalorder %s7166_s15, %s7166_s15 }
  0x8c   :  { %v34_v8 = vpop.xlane.xlu0 %33  ;;  %v40_v9 = vpop.xlane.xlu1 %39 }
  0x8d   :  { %v45_v10 = vmul.f32 0.03125, %v34_v8  ;;  %v47_v11 = vmul.f32 0.03125, %v40_v9  ;;  %v335_v8 = vshrl.u32 %v334_v4, 7 }
  0x8f   :  { %v49_v12 = vsub.f32 %v27_v0, %v45_v10  ;;  %v51_v13 = vsub.f32 %v29_v1, %v47_v11 }
  0x90   :  { %v37_v14 = vpop.xlane.xlu0 %36  ;;  %v43_v15 = vpop.xlane.xlu1 %42 }
  0x91   :  { %v46_v16 = vmul.f32 0.03125, %v37_v14  ;;  %v48_v17 = vmul.f32 0.03125, %v43_v15  ;;  %v53_v18 = vmul.f32 %v49_v12, %v49_v12  ;;  %v55_v19 = vmul.f32 %v51_v13, %v51_v13 }
  0x93   :  { %v50_v20 = vsub.f32 %v28_v2, %v46_v16  ;;  %v52_v21 = vsub.f32 %v30_v5, %v48_v17  ;;  %v57_v22 = vsel %vm31_vm0, %v53_v18, 0.0  ;;  %v63_v23 = vsel %vm31_vm0, %v55_v19, 0.0 }
  0x94   :  { %58 = vadd.xlane.f32.xlu0 %v57_v22  ;;  %v8045_v2 = vmov 1983009808   ;;  %v8046_v5 = vmov 1934713408  }
  0x95   :  { %v54_v24 = vmul.f32 %v50_v20, %v50_v20  ;;  %v56_v25 = vmul.f32 %v52_v21, %v52_v21  ;;  %v332_v3 = vunpack.c.l.s4 %v8045_v2  ;;  %v396_v6 = vunpack.c.l.s4 %v8046_v5 }
  0x97   :  { %v60_v26 = vsel %vm31_vm0, %v54_v24, 0.0  ;;  %v66_v27 = vsel %vm31_vm0, %v56_v25, 0.0  ;;  %v333_v7 = vunpack.c.0.s8 %v332_v3  ;;  %v397_v11 = vunpack.c.0.s8 %v396_v6  ;;  %v1990_v3 = vld [vmem:[%s10020_s1 + $0x68] sm:$0xff]  ;;  %v1992_v6 = vld [vmem:[%s10020_s1 + $0x78] sm:$0xff] }
  0x98   :  { %64 = vadd.xlane.f32.xlu0 %v63_v23  ;;  %61 = vadd.xlane.f32.xlu1 %v60_v26 }
  0x99   :  { %v8221_v18 = vsub.s32 %v397_v11, %v335_v8 }
  0x9c   :  { %67 = vadd.xlane.f32.xlu1 %v66_v27 }
 0x11d   :  { %v59_v32 = vpop.xlane.xlu0 %58 }
 0x11e   :  { %v69_v33 = vmul.f32 0.03125, %v59_v32 }
 0x120   :  { %v73_v34 = vadd.f32 1e-05, %v69_v33 }
 0x121   :  { %v62_v35 = vpop.xlane.xlu1 %61  ;;  %v65_v36 = vpop.xlane.xlu0 %64 }
 0x122   :  { %7938 = vrsqrt.f32 %v73_v34  ;;  %v70_v37 = vmul.f32 0.03125, %v62_v35  ;;  %v71_v38 = vmul.f32 0.03125, %v65_v36 }
 0x124   :  { %v74_v39 = vadd.f32 1e-05, %v70_v37  ;;  %v75_v40 = vadd.f32 1e-05, %v71_v38  ;;  %v1984_v38 = vld [vmem:[%s10020_s1 + $0x38] sm:$0xff] }
 0x125   :  { %v68_v41 = vpop.xlane.xlu1 %67 }
 0x126   :  { %7940 = vrsqrt.f32 %v74_v39  ;;  %v72_v42 = vmul.f32 0.03125, %v68_v41  ;;  %v1981_v41 = vld [vmem:[%s10020_s1 + $0x20] sm:$0xff] }
 0x127   :  { %7942 = vrsqrt.f32 %v75_v40 }
 0x128   :  { %v76_v43 = vadd.f32 1e-05, %v72_v42 }
 0x12a   :  { %7944 = vrsqrt.f32 %v76_v43 }
 0x12f   :  { %v7939_v44 = vpop.eup %7938 }
 0x130   :  { %v81_v45 = vmul.f32 %v7939_v44, %v49_v12  ;;  %v8217_v12 = vsub.s32 %v333_v7, %v335_v8  ;;  %v1989_v8 = vld [vmem:[%s10020_s1 + $0x60] sm:$0xff] }
 0x132   :  { %7562 = vmatprep.mubr.msk.f32.mxu1 %vm31_vm0, %v81_v45 }
 0x133   :  { %v7941_v46 = vpop.eup %7940 }
 0x134   :  { %v7943_v47 = vpop.eup %7942  ;;  %v82_v48 = vmul.f32 %v7941_v46, %v50_v20 }
 0x135   :  { %v83_v49 = vmul.f32 %v7943_v47, %v51_v13 }
 0x136   :  { %7563 = vmatmul.mubr.msk.f32.vlgmr.msra.gmra.mxu1 %vm31_vm0, %v82_v48 }
 0x137   :  { %v7945_v50 = vpop.eup %7944  ;;  %7565 = vmatprep.mubr.msk.f32.mxu1 %vm31_vm0, %v83_v49  ;;  %7569 = vmatpush3.xpose.msk.msra.mxu1 %vm2041_vm1, %v1978_v53  ;;  %v1983_v49 = vld [vmem:[%s10020_s1 + $0x30] sm:$0xff] }
 0x138   :  { %v84_v51 = vmul.f32 %v7945_v50, %v52_v21  ;;  %7570 = vmatprep.subr.mxu1 %v10029_v52 }
 0x13a   :  { %7566 = vmatmul.mubr.msk.f32.gmra.mxu1 %vm31_vm0, %v84_v51 }
 0x13b   :  { %7571 = vmatpush3.xpose.msk.msra.mxu1 %vm2041_vm1, %v1977_v56  ;;  %7572 = vmatprep.mubr.msk.f32.mxu1 %vm8033_vm2, %v10029_v52  ;;  %v1986_v56 = vld [vmem:[%s10020_s1 + $0x48] sm:$0xff] }
 0x13c   :  { %7582 = vmatprep.subr.mxu1 %v10029_v52 }
 0x1f6   :  { %v7564_v55 = vpop.f32.mrf.mxu1 }
 0x1f7   :  { %v8161_v62 = vadd.f32 %v7564_v55, %v7176_v57 }
 0x1f8   :  { %v174_v58 = vpop.f32.mrf.mxu1 }
 0x1f9   :  { %v8151_v60 = vadd.f32 %v7176_v57, %v174_v58  ;;  %v1988_v58 = vld [vmem:[%s10020_s1 + $0x58] sm:$0xff] }
 0x1fa   :  { %v7567_v61 = vpop.f32.mrf.mxu1 }
 0x1fb   :  { %209 = vrot.lane.b32.xlu1 %v8151_v60, %s8034_s4  ;;  %197 = vrot.lane.b32.xlu0 %v8151_v60, %s8035_s25  ;;  %v8171_v1 = vadd.f32 %v7567_v61, %v7176_v57  ;;  %v1985_v61 = vld [vmem:[%s10020_s1 + $0x40] sm:$0xff] }
 0x1fc   :  { %v184_v63 = vpop.f32.mrf.mxu1 }
 0x1fd   :  { %v8165_v0 = vadd.f32 %v7176_v57, %v184_v63  ;;  %v1987_v63 = vld [vmem:[%s10020_s1 + $0x50] sm:$0xff] }
 0x1ff   :  { %221 = vrot.lane.b32.xlu1 %v8151_v60, %s8036_s26  ;;  %211 = vrot.lane.b32.xlu0 %v8161_v62, %s8034_s4  ;;  %10034 = vst [vmem:[#allocation5_spill] sm:$0xff] %v8165_v0 }
 0x203   :  { %199 = vrot.lane.b32.xlu1 %v8161_v62, %s8035_s25  ;;  %201 = vrot.lane.b32.xlu0 %v8165_v0, %s8035_s25 }
 0x207   :  { %223 = vrot.lane.b32.xlu1 %v8161_v62, %s8036_s26  ;;  %225 = vrot.lane.b32.xlu0 %v8165_v0, %s8036_s26 }
 0x20b   :  { %213 = vrot.lane.b32.xlu1 %v8165_v0, %s8034_s4  ;;  %215 = vrot.lane.b32.xlu0 %v8171_v1, %s8034_s4 }
 0x20f   :  { %203 = vrot.lane.b32.xlu1 %v8171_v1, %s8035_s25  ;;  %235 = vrot.lane.b32.xlu0 %v8161_v62, %s8037_s27 }
 0x213   :  { %227 = vrot.lane.b32.xlu1 %v8171_v1, %s8036_s26  ;;  %259 = vrot.lane.b32.xlu0 %v8161_v62, %s8038_s28 }
 0x217   :  { %247 = vrot.lane.b32.xlu1 %v8161_v62, %s8039_s29  ;;  %233 = vrot.lane.b32.xlu0 %v8151_v60, %s8037_s27 }
 0x21b   :  { %271 = vrot.lane.b32.xlu1 %v8161_v62, %s8040_s30  ;;  %257 = vrot.lane.b32.xlu0 %v8151_v60, %s8038_s28 }
 0x21f   :  { %245 = vrot.lane.b32.xlu1 %v8151_v60, %s8039_s29  ;;  %239 = vrot.lane.b32.xlu0 %v8171_v1, %s8037_s27 }
 0x223   :  { %269 = vrot.lane.b32.xlu1 %v8151_v60, %s8040_s30  ;;  %263 = vrot.lane.b32.xlu0 %v8171_v1, %s8038_s28 }
 0x227   :  { %251 = vrot.lane.b32.xlu1 %v8171_v1, %s8039_s29  ;;  %237 = vrot.lane.b32.xlu0 %v8165_v0, %s8037_s27 }
 0x22b   :  { %275 = vrot.lane.b32.xlu1 %v8171_v1, %s8040_s30  ;;  %261 = vrot.lane.b32.xlu0 %v8165_v0, %s8038_s28 }
 0x22f   :  { %249 = vrot.lane.b32.xlu1 %v8165_v0, %s8039_s29  ;;  %283 = vrot.lane.b32.xlu0 %v8161_v62, %s8041_s8 }
 0x233   :  { %273 = vrot.lane.b32.xlu1 %v8165_v0, %s8040_s30  ;;  %281 = vrot.lane.b32.xlu0 %v8151_v60, %s8041_s8  ;;  %s8047_s30 = smov 8  }
 0x237   :  { %295 = vrot.lane.b32.xlu1 %v8161_v62, %s8042_s0  ;;  %287 = vrot.lane.b32.xlu0 %v8171_v1, %s8041_s8 }
 0x23b   :  { %307 = vrot.lane.b32.xlu1 %v8161_v62, %s8043_s9 }
 0x23f   :  { %319 = vrot.lane.b32.xlu1 %v8161_v62, %s8044_s10 }
 0x243   :  { %293 = vrot.lane.b32.xlu1 %v8151_v60, %s8042_s0 }
 0x247   :  { %305 = vrot.lane.b32.xlu1 %v8151_v60, %s8043_s9 }
 0x24b   :  { %317 = vrot.lane.b32.xlu1 %v8151_v60, %s8044_s10 }
 0x24f   :  { %299 = vrot.lane.b32.xlu1 %v8171_v1, %s8042_s0 }
 0x253   :  { %311 = vrot.lane.b32.xlu1 %v8171_v1, %s8043_s9 }
 0x257   :  { %323 = vrot.lane.b32.xlu1 %v8171_v1, %s8044_s10 }
 0x26d   :  { %v210_v9 = vpop.permute.xlu1 %209  ;;  %v198_v10 = vpop.permute.xlu0 %197 }
 0x26e   :  { %v329_v13 = vcombine.low %v8151_v60, %v210_v9  ;;  %v330_v14 = vcombine.high %v8151_v60, %v210_v9  ;;  %v1991_v9 = vld [vmem:[%s10020_s1 + $0x70] sm:$0xff] }
 0x270   :  { %v337_v19 = vrot.slane %v329_v13, %v8217_v12  ;;  %v344_v20 = vrot.slane %v330_v14, %v8217_v12 }
 0x271   :  { %v222_v15 = vpop.permute.xlu1 %221  ;;  %v8227_v23 = vpop.permute.xlu0 %211 }
 0x272   :  { %v345_v16 = vcombine.low %v198_v10, %v222_v15  ;;  %v346_v17 = vcombine.high %v198_v10, %v222_v15  ;;  %v533_v30 = vcombine.low %v8161_v62, %v8227_v23  ;;  %v1994_v15 = vld [vmem:[%s10020_s1 + $0x88] sm:$0xff] }
 0x274   :  { %v353_v21 = vrot.slane %v345_v16, %v8217_v12  ;;  %v360_v22 = vrot.slane %v346_v17, %v8217_v12  ;;  %v541_v39 = vrot.slane %v533_v30, %v8217_v12  ;;  %v1996_v17 = vld [vmem:[%s10020_s1 + $0x98] sm:$0xff]  ;;  %v534_v30 = vcombine.high %v8161_v62, %v8227_v23  ;;  %v1997_v23 = vld [vmem:[%s10020_s1 + $0xa0] sm:$0xff] }
 0x275   :  { %v8229_v24 = vpop.permute.xlu1 %199  ;;  %v8278_v48 = vpop.permute.xlu0 %201 }
 0x276   :  { %v393_v25 = vcombine.low %v337_v19, %v353_v21  ;;  %v394_v26 = vcombine.high %v337_v19, %v353_v21  ;;  %v409_v27 = vcombine.low %v344_v20, %v360_v22  ;;  %v410_v28 = vcombine.high %v344_v20, %v360_v22  ;;  %v1993_v22 = vld [vmem:[%s10020_s1 + $0x80] sm:$0xff] }
 0x278   :  { %v8232_v29 = vrot.slane %v393_v25, %v8221_v18  ;;  %v8240_v32 = vrot.slane %v394_v26, %v8221_v18  ;;  %v8243_v33 = vrot.slane %v409_v27, %v8221_v18  ;;  %v8246_v34 = vrot.slane %v410_v28, %v8221_v18  ;;  %v1995_v26 = vld [vmem:[%s10020_s1 + $0x90] sm:$0xff] }
 0x279   :  { %v8248_v35 = vpop.permute.xlu1 %223  ;;  %v8311_v59 = vpop.permute.xlu0 %225 }
 0x27a   :  { %v549_v36 = vcombine.low %v8229_v24, %v8248_v35  ;;  %7573 = vmatmul.mubr.msk.f32.vlgmr.msra.gmra.mxu1 %vm2041_vm1, %v8232_v29  ;;  %v1961_v37 = vcombine.high %v8232_v29, %v10029_v52  ;;  %v7181_v43 = vcombine.low %v8232_v29, %v8240_v32  ;;  %v7183_v44 = vcombine.high %v8232_v29, %v8240_v32  ;;  %v1998_v29 = vld [vmem:[%s10020_s1 + $0xa8] sm:$0xff] }
 0x27b   :  { %7583 = vmatpush3.xpose.msk.msra.mxu1 %vm2041_vm1, %v1982_v31  ;;  %7586 = vmatprep.mubr.msk.f32.mxu1 %vm8033_vm2, %v10029_v52  ;;  %v7185_v45 = vcombine.low %v8243_v33, %v8246_v34  ;;  %v1962_v57 = vcombine.high %v8240_v32, %v10029_v52  ;;  %v1963_v5 = vcombine.high %v8243_v33, %v10029_v52 }
 0x27c   :  { %v557_v40 = vrot.slane %v549_v36, %v8217_v12  ;;  %7584 = vmatprep.subr.mxu1 %v10029_v52  ;;  %7580 = vmatmul.mubr.msk.f32.vlgmr.msra.gmra.mxu0 %vm2041_vm1, %v1961_v37  ;;  %v8363_v10 = vrot.slane %v7181_v43, %v8217_v12  ;;  %v8366_v11 = vrot.slane %v7183_v44, %v8217_v12 }
 0x27d   :  { %v8269_v42 = vpop.permute.xlu1 %213  ;;  %7590 = vmatpush3.xpose.msk.msra.mxu0 %vm2041_vm1, %v1984_v38  ;;  %7593 = vmatprep.mubr.msk.f32.mxu0 %vm8033_vm2, %v10029_v52  ;;  %v8338_v4 = vpop.permute.xlu0 %215  ;;  %v1964_v16 = vcombine.high %v8246_v34, %v10029_v52  ;;  %v7187_v19 = vcombine.high %v8243_v33, %v8246_v34  ;;  %v550_v28 = vcombine.high %v8229_v24, %v8248_v35 }
 0x27e   :  { %v597_v46 = vcombine.low %v541_v39, %v557_v40  ;;  %v598_v47 = vcombine.high %v541_v39, %v557_v40  ;;  %7591 = vmatprep.subr.mxu0 %v10029_v52  ;;  %v1209_v20 = vcombine.low %v8363_v10, %v8366_v11  ;;  %v548_v36 = vrot.slane %v534_v30, %v8217_v12  ;;  %v1999_v39 = vld [vmem:[%s10020_s1 + $0xb0] sm:$0xff] }
 0x27f   :  { %7585 = vmatpush3.xpose.msk.msra.mxu1 %vm2041_vm1, %v1981_v41  ;;  %v564_v62 = vrot.slane %v550_v28, %v8217_v12  ;;  %v8449_v37 = vrot.slane %v7185_v45, %v8217_v12  ;;  %v8452_v38 = vrot.slane %v7187_v19, %v8217_v12  ;;  %v2002_v45 = vld [vmem:[%s10020_s1 + $0xc8] sm:$0xff] }
 0x280   :  { %v8285_v50 = vrot.slane %v597_v46, %v8221_v18  ;;  %v8288_v51 = vrot.slane %v598_v47, %v8221_v18  ;;  %7596 = vmatprep.subr.mxu1 %v10029_v52  ;;  %v738_v46 = vcombine.high %v8165_v0, %v8269_v42  ;;  %v8478_v47 = vrot.slane %v1209_v20, %v8221_v18 }
 0x281   :  { %v8291_v53 = vpop.permute.xlu1 %203  ;;  %7592 = vmatpush3.xpose.msk.msra.mxu0 %vm2041_vm1, %v1983_v49  ;;  %v8368_v13 = vpop.permute.xlu0 %235  ;;  %v613_v41 = vcombine.low %v548_v36, %v564_v62  ;;  %v614_v43 = vcombine.high %v548_v36, %v564_v62  ;;  %v1241_v49 = vcombine.low %v8449_v37, %v8452_v38 }
 0x282   :  { %v7189_v54 = vcombine.low %v8285_v50, %v8288_v51  ;;  %v7191_v55 = vcombine.high %v8285_v50, %v8288_v51  ;;  %7587 = vmatmul.mubr.msk.f32.vlgmr.msra.gmra.mxu1 %vm2041_vm1, %v8240_v32  ;;  %7603 = vmatprep.subr.mxu0 %v10029_v52  ;;  %v1965_v24 = vcombine.high %v8285_v50, %v10029_v52  ;;  %v2000_v32 = vld [vmem:[%s10020_s1 + $0xb8] sm:$0xff] }
 0x283   :  { %7597 = vmatpush3.xpose.msk.msra.mxu1 %vm2041_vm1, %v1986_v56  ;;  %7600 = vmatprep.mubr.msk.f32.mxu1 %vm8033_vm2, %v10029_v52  ;;  %v754_v56 = vcombine.high %v8278_v48, %v8311_v59 }
 0x284   :  { %7594 = vmatmul.mubr.msk.f32.vlgmr.msra.gmra.mxu0 %vm2041_vm1, %v1962_v57  ;;  %7598 = vmatprep.subr.mxu1 %v10029_v52  ;;  %v941_v57 = vcombine.low %v8171_v1, %v8338_v4 }
 0x285   :  { %v8314_v60 = vpop.permute.xlu1 %227  ;;  %7604 = vmatpush3.xpose.msk.msra.mxu0 %vm2041_vm1, %v1988_v58  ;;  %7607 = vmatprep.mubr.msk.f32.mxu0 %vm8033_vm2, %v10029_v52  ;;  %v8401_v25 = vpop.permute.xlu0 %259  ;;  %v942_v58 = vcombine.high %v8171_v1, %v8338_v4  ;;  %v2004_v1 = vld [vmem:[%s10020_s1 + $0xd8] sm:$0xff]  ;;  %v2001_v4 = vld [vmem:[%s10020_s1 + $0xc0] sm:$0xff] }
 0x286   :  { %7605 = vmatprep.subr.mxu0 %v10029_v52  ;;  %v565_v36 = vcombine.low %v8368_v13, %v8401_v25 }
 0x287   :  { %7599 = vmatpush3.xpose.msk.msra.mxu1 %vm2041_vm1, %v1985_v61 }
 0x288   :  { %7610 = vmatprep.subr.mxu1 %v10029_v52 }
 0x289   :  { %v8330_v2 = vpop.permute.xlu1 %247  ;;  %7606 = vmatpush3.xpose.msk.msra.mxu0 %vm2041_vm1, %v1987_v63  ;;  %v8424_v31 = vpop.permute.xlu0 %233  ;;  %v621_v63 = vrot.slane %v613_v41, %v8221_v18  ;;  %v2006_v41 = vld [vmem:[%s10020_s1 + $0xe8] sm:$0xff] }
 0x28a   :  { %7601 = vmatmul.mubr.msk.f32.vlgmr.msra.gmra.mxu1 %vm2041_vm1, %v8243_v33  ;;  %7617 = vmatprep.subr.mxu0 %v10029_v52  ;;  %v753_v33 = vcombine.low %v8278_v48, %v8311_v59  ;;  %v8505_v48 = vrot.slane %v1241_v49, %v8221_v18  ;;  %v573_v49 = vrot.slane %v565_v36, %v8217_v12 }
 0x28b   :  { %7611 = vmatpush3.xpose.msk.msra.mxu1 %vm2041_vm1, %v1990_v3  ;;  %7614 = vmatprep.mubr.msk.f32.mxu1 %vm8033_vm2, %v10029_v52  ;;  %v8496_v3 = vrot.slane %v614_v43, %v8221_v18  ;;  %v8557_v43 = vrot.slane %v7189_v54, %v8217_v12 }
 0x28c   :  { %7608 = vmatmul.mubr.msk.f32.vlgmr.msra.gmra.mxu0 %vm2041_vm1, %v1963_v5  ;;  %7612 = vmatprep.subr.mxu1 %v10029_v52  ;;  %v752_v5 = vrot.slane %v738_v46, %v8217_v12 }
 0x28d   :  { %v8350_v7 = vpop.permute.xlu1 %271  ;;  %7618 = vmatpush3.xpose.msk.msra.mxu0 %vm2041_vm1, %v1992_v6  ;;  %7621 = vmatprep.mubr.msk.f32.mxu0 %vm8033_vm2, %v10029_v52  ;;  %v8466_v44 = vpop.permute.xlu0 %257  ;;  %v7193_v20 = vcombine.low %v621_v63, %v8496_v3 }
 0x28e   :  { %7619 = vmatprep.subr.mxu0 %v10029_v52  ;;  %v581_v28 = vcombine.low %v8330_v2, %v8350_v7 }
 0x28f   :  { %7613 = vmatpush3.xpose.msk.msra.mxu1 %vm2041_vm1, %v1989_v8  ;;  %v761_v8 = vrot.slane %v753_v33, %v8217_v12  ;;  %v958_v33 = vcombine.high %v8291_v53, %v8314_v60 }
 0x290   :  { %7624 = vmatprep.subr.mxu1 %v10029_v52 }
 0x291   :  { %v8371_v14 = vpop.permute.xlu1 %245  ;;  %7620 = vmatpush3.xpose.msk.msra.mxu0 %vm2041_vm1, %v1991_v9  ;;  %v768_v9 = vrot.slane %v754_v56, %v8217_v12 }
 0x292   :  { %7615 = vmatmul.mubr.msk.f32.vlgmr.msra.gmra.mxu1 %vm2041_vm1, %v8246_v34  ;;  %7631 = vmatprep.subr.mxu0 %v10029_v52  ;;  %v737_v34 = vcombine.low %v8165_v0, %v8269_v42  ;;  %v1966_v42 = vcombine.high %v8288_v51, %v10029_v52 }
 0x293   :  { %7625 = vmatpush3.xpose.msk.msra.mxu1 %vm2041_vm1, %v1994_v15  ;;  %7628 = vmatprep.mubr.msk.f32.mxu1 %vm8033_vm2, %v10029_v52  ;;  %v8520_v15 = vrot.slane %v941_v57, %v8217_v12  ;;  %v817_v62 = vcombine.low %v752_v5, %v768_v9  ;;  %v2005_v57 = vld [vmem:[%s10020_s1 + $0xe0] sm:$0xff] }
 0x294   :  { %7622 = vmatmul.mubr.msk.f32.vlgmr.msra.gmra.mxu0 %vm2041_vm1, %v1964_v16  ;;  %7626 = vmatprep.subr.mxu1 %v10029_v52  ;;  %v745_v59 = vrot.slane %v737_v34, %v8217_v12  ;;  %v8523_v16 = vrot.slane %v942_v58, %v8217_v12  ;;  %v566_v34 = vcombine.high %v8368_v13, %v8401_v25  ;;  %v2008_v13 = vld [vmem:[%s10020_s1 + $0xf8] sm:$0xff] }
 0x295   :  { %v8394_v21 = vpop.permute.xlu1 %269  ;;  %7632 = vmatpush3.xpose.msk.msra.mxu0 %vm2041_vm1, %v1996_v17  ;;  %7635 = vmatprep.mubr.msk.f32.mxu0 %vm8033_vm2, %v10029_v52  ;;  %v8525_v17 = vpop.permute.xlu0 %239  ;;  %v8584_v25 = vrot.slane %v7193_v20, %v8217_v12  ;;  %v8600_v46 = vrot.slane %v817_v62, %v8221_v18 }
 0x296   :  { %7633 = vmatprep.subr.mxu0 %v10029_v52  ;;  %v801_v30 = vcombine.low %v745_v59, %v761_v8 }
 0x297   :  { %7627 = vmatpush3.xpose.msk.msra.mxu1 %vm2041_vm1, %v1993_v22  ;;  %v7195_v22 = vcombine.high %v621_v63, %v8496_v3 }
 0x298   :  { %7638 = vmatprep.subr.mxu1 %v10029_v52 }
 0x299   :  { %v8409_v27 = vpop.permute.xlu1 %251  ;;  %7634 = vmatpush3.xpose.msk.msra.mxu0 %vm2041_vm1, %v1995_v26  ;;  %v957_v26 = vcombine.low %v8291_v53, %v8314_v60  ;;  %v589_v53 = vrot.slane %v581_v28, %v8217_v12  ;;  %v1967_v60 = vcombine.high %v621_v63, %v10029_v52 }
 0x29a   :  { %7629 = vmatmul.mubr.msk.f32.vlgmr.msra.gmra.mxu1 %vm2041_vm1, %v8285_v50  ;;  %7645 = vmatprep.subr.mxu0 %v10029_v52  ;;  %v8587_v50 = vrot.slane %v7195_v22, %v8217_v12 }
 0x29b   :  { %7639 = vmatpush3.xpose.msk.msra.mxu1 %vm2041_vm1, %v1998_v29  ;;  %7642 = vmatprep.mubr.msk.f32.mxu1 %vm8033_vm2, %v10029_v52  ;;  %v2003_v29 = vld [vmem:[%s10020_s1 + $0xd0] sm:$0xff]  ;;  %v8574_v54 = vrot.slane %v957_v26, %v8217_v12 }
 0x29c   :  { %7636 = vmatmul.mubr.msk.f32.vlgmr.msra.gmra.mxu0 %vm2041_vm1, %v1965_v24  ;;  %7640 = vmatprep.subr.mxu1 %v10029_v52  ;;  %v802_v24 = vcombine.high %v745_v59, %v761_v8  ;;  %v1968_v8 = vcombine.high %v8496_v3, %v10029_v52  ;;  %v1377_v22 = vcombine.low %v8584_v25, %v8587_v50 }
 0x29d   :  { %v8434_v35 = vpop.permute.xlu1 %275  ;;  %7646 = vmatpush3.xpose.msk.msra.mxu0 %vm2041_vm1, %v2000_v32  ;;  %7649 = vmatprep.mubr.msk.f32.mxu0 %vm8033_vm2, %v10029_v52  ;;  %v1005_v59 = vcombine.low %v8520_v15, %v8574_v54  ;;  %v1006_v62 = vcombine.high %v8520_v15, %v8574_v54  ;;  %v361_v54 = vcombine.low %v8424_v31, %v8466_v44 }
 0x29e   :  { %7647 = vmatprep.subr.mxu0 %v10029_v52 }
 0x29f   :  { %7641 = vmatpush3.xpose.msk.msra.mxu1 %vm2041_vm1, %v1997_v23  ;;  %v818_v23 = vcombine.high %v752_v5, %v768_v9  ;;  %v2007_v5 = vld [vmem:[%s10020_s1 + $0xf0] sm:$0xff]  ;;  %v630_v9 = vcombine.high %v573_v49, %v589_v53 }
 0x2a0   :  { %7652 = vmatprep.subr.mxu1 %v10029_v52 }
 0x2a1   :  { %v8458_v40 = vpop.permute.xlu1 %249  ;;  %7648 = vmatpush3.xpose.msk.msra.mxu0 %vm2041_vm1, %v1999_v39  ;;  %v582_v39 = vcombine.high %v8330_v2, %v8350_v7  ;;  %v8571_v7 = vrot.slane %v7191_v55, %v8217_v12  ;;  %v8592_v55 = vpop.permute.xlu0 %263  ;;  %v8609_v58 = vrot.slane %v818_v23, %v8221_v18 }
 0x2a2   :  { %7643 = vmatmul.mubr.msk.f32.vlgmr.msra.gmra.mxu1 %vm2041_vm1, %v8288_v51  ;;  %7659 = vmatprep.subr.mxu0 %v10029_v52  ;;  %v8590_v51 = vrot.slane %v801_v30, %v8221_v18  ;;  %v1210_v30 = vcombine.high %v8363_v10, %v8366_v11  ;;  %v8657_v10 = vrot.slane %v1377_v22, %v8221_v18 }
 0x2a3   :  { %7653 = vmatpush3.xpose.msk.msra.mxu1 %vm2041_vm1, %v2002_v45  ;;  %7656 = vmatprep.mubr.msk.f32.mxu1 %vm8033_vm2, %v10029_v52  ;;  %v8597_v45 = vrot.slane %v802_v24, %v8221_v18  ;;  %v596_v56 = vrot.slane %v582_v39, %v8217_v12  ;;  %v1345_v20 = vcombine.low %v8557_v43, %v8571_v7 }
 0x2a4   :  { %7650 = vmatmul.mubr.msk.f32.vlgmr.msra.gmra.mxu0 %vm2041_vm1, %v1966_v42  ;;  %7654 = vmatprep.subr.mxu1 %v10029_v52  ;;  %v8612_v42 = vrot.slane %v958_v33, %v8217_v12  ;;  %v1242_v24 = vcombine.high %v8449_v37, %v8452_v38  ;;  %v377_v37 = vcombine.low %v8371_v14, %v8394_v21  ;;  %v2012_v38 = vld [vmem:[%s10020_s1 + $0x118] sm:$0xff] }
 0x2a5   :  { %v8492_v61 = vpop.permute.xlu1 %273  ;;  %7660 = vmatpush3.xpose.msk.msra.mxu0 %vm2041_vm1, %v2004_v1  ;;  %7663 = vmatprep.mubr.msk.f32.mxu0 %vm8033_vm2, %v10029_v52  ;;  %v8648_v36 = vpop.permute.xlu0 %237  ;;  %v1969_v15 = vcombine.high %v8590_v51, %v10029_v52  ;;  %v8672_v33 = vcombine.high %v8597_v45, %v10029_v52  ;;  %v369_v22 = vrot.slane %v361_v54, %v8217_v12 }
 0x2a6   :  { %7661 = vmatprep.subr.mxu0 %v10029_v52  ;;  %v1021_v23 = vcombine.low %v8523_v16, %v8612_v42 }
 0x2a7   :  { %7655 = vmatpush3.xpose.msk.msra.mxu1 %vm2041_vm1, %v2001_v4  ;;  %v629_v4 = vcombine.low %v573_v49, %v589_v53  ;;  %v644_v53 = vrot.slane %v630_v9, %v8221_v18  ;;  %v378_v49 = vcombine.high %v8371_v14, %v8394_v21  ;;  %v8703_v21 = vrot.slane %v1005_v59, %v8221_v18 }
 0x2a8   :  { %7666 = vmatprep.subr.mxu1 %v10029_v52  ;;  %v8712_v9 = vcombine.high %v8600_v46, %v10029_v52  ;;  %v362_v59 = vcombine.high %v8424_v31, %v8466_v44  ;;  %v2014_v31 = vld [vmem:[%s10020_s1 + $0x128] sm:$0xff] }
 0x2a9   :  { %v8528_v19 = vpop.permute.xlu1 %295  ;;  %7662 = vmatpush3.xpose.msk.msra.mxu0 %vm2041_vm1, %v2003_v29  ;;  %v2010_v29 = vld [vmem:[%s10020_s1 + $0x108] sm:$0xff]  ;;  %v392_v54 = vrot.slane %v378_v49, %v8217_v12 }
 0x2aa   :  { %7657 = vmatmul.mubr.msk.f32.vlgmr.msra.gmra.mxu1 %vm2041_vm1, %v621_v63  ;;  %7673 = vmatprep.subr.mxu0 %v10029_v52  ;;  %v580_v63 = vrot.slane %v566_v34, %v8217_v12  ;;  %v637_v34 = vrot.slane %v629_v4, %v8221_v18  ;;  %v8698_v4 = vrot.slane %v1242_v24, %v8221_v18 }
 0x2ab   :  { %7667 = vmatpush3.xpose.msk.msra.mxu1 %vm2041_vm1, %v2006_v41  ;;  %7670 = vmatprep.mubr.msk.f32.mxu1 %vm8033_vm2, %v10029_v52  ;;  %v8654_v41 = vrot.slane %v1345_v20, %v8221_v18  ;;  %v8716_v20 = vcombine.high %v8609_v58, %v10029_v52  ;;  %v8737_v24 = vrot.slane %v1006_v62, %v8221_v18  ;;  %v2016_v62 = vld [vmem:[%s10020_s1 + $0x138] sm:$0xff] }
 0x2ac   :  { %7664 = vmatmul.mubr.msk.f32.vlgmr.msra.gmra.mxu0 %vm2041_vm1, %v1967_v60  ;;  %7668 = vmatprep.subr.mxu1 %v10029_v52  ;;  %v645_v26 = vcombine.low %v580_v63, %v596_v56  ;;  %v646_v28 = vcombine.high %v580_v63, %v596_v56  ;;  %v2009_v56 = vld [vmem:[%s10020_s1 + $0x100] sm:$0xff]  ;;  %v8695_v63 = vrot.slane %v1210_v30, %v8221_v18 }
 0x2ad   :  { %v8565_v2 = vpop.permute.xlu1 %307  ;;  %7674 = vmatpush3.xpose.msk.msra.mxu0 %vm2041_vm1, %v2008_v13  ;;  %7677 = vmatprep.mubr.msk.f32.mxu0 %vm8033_vm2, %v10029_v52  ;;  %v7192_v30 = vcombine.high %v637_v34, %v644_v53 }
 0x2ae   :  { %7675 = vmatprep.subr.mxu0 %v10029_v52  ;;  %v653_v60 = vrot.slane %v645_v26, %v8221_v18  ;;  %v660_v13 = vrot.slane %v646_v28, %v8221_v18  ;;  %v8721_v26 = vpop.permute.xlu0 %261 }
 0x2af   :  { %7669 = vmatpush3.xpose.msk.msra.mxu1 %vm2041_vm1, %v2005_v57 }
 0x2b0   :  { %7680 = vmatprep.subr.mxu1 %v10029_v52 }
 0x2b1   :  { %v8617_v1 = vpop.permute.xlu1 %319  ;;  %7676 = vmatpush3.xpose.msk.msra.mxu0 %vm2041_vm1, %v2007_v5  ;;  %v385_v5 = vrot.slane %v377_v37, %v8217_v12  ;;  %v7194_v37 = vcombine.low %v653_v60, %v660_v13 }
 0x2b2   :  { %7671 = vmatmul.mubr.msk.f32.vlgmr.msra.gmra.mxu1 %vm2041_vm1, %v8496_v3  ;;  %7687 = vmatprep.subr.mxu0 %v10029_v52  ;;  %v686_v44 = vcombine.high %v8528_v19, %v8617_v1  ;;  %v2020_v3 = vld [vmem:[%s10020_s1 + $0x158] sm:$0xff] }
 0x2b3   :  { %7681 = vmatpush3.xpose.msk.msra.mxu1 %vm2041_vm1, %v2010_v29  ;;  %7684 = vmatprep.mubr.msk.f32.mxu1 %vm8033_vm2, %v10029_v52  ;;  %v7190_v29 = vcombine.low %v637_v34, %v644_v53  ;;  %v8744_v53 = vrot.slane %v1021_v23, %v8221_v18  ;;  %v426_v14 = vcombine.high %v369_v22, %v385_v5 }
 0x2b4   :  { %7678 = vmatmul.mubr.msk.f32.vlgmr.msra.gmra.mxu0 %vm2041_vm1, %v1968_v8  ;;  %7682 = vmatprep.subr.mxu1 %v10029_v52  ;;  %v2011_v8 = vld [vmem:[%s10020_s1 + $0x110] sm:$0xff]  ;;  %v1346_v23 = vcombine.high %v8557_v43, %v8571_v7  ;;  %v700_v6 = vrot.slane %v686_v44, %v8217_v12 }
 0x2b5   :  { %v8651_v39 = vpop.permute.xlu1 %293  ;;  %7688 = vmatpush3.xpose.msk.msra.mxu0 %vm2041_vm1, %v2012_v38  ;;  %7691 = vmatprep.mubr.msk.f32.mxu0 %vm8033_vm2, %v10029_v52  ;;  %v7196_v38 = vcombine.high %v653_v60, %v660_v13  ;;  %v376_v60 = vrot.slane %v362_v59, %v8217_v12  ;;  %v973_v13 = vcombine.low %v8525_v17, %v8592_v55  ;;  %v2013_v59 = vld [vmem:[%s10020_s1 + $0x120] sm:$0xff] }
 0x2b6   :  { %7689 = vmatprep.subr.mxu0 %v10029_v52  ;;  %v8761_v49 = vrot.slane %v7190_v29, %v8217_v12  ;;  %v284_v29 = vpop.permute.xlu0 %283 }
 0x2b7   :  { %7683 = vmatpush3.xpose.msk.msra.mxu1 %vm2041_vm1, %v2009_v56  ;;  %v425_v56 = vcombine.low %v369_v22, %v385_v5  ;;  %v8764_v5 = vrot.slane %v7192_v30, %v8217_v12  ;;  %v8774_v22 = vrot.slane %v7194_v37, %v8217_v12  ;;  %v8777_v43 = vrot.slane %v7196_v38, %v8217_v12  ;;  %v2015_v37 = vld [vmem:[%s10020_s1 + $0x130] sm:$0xff] }
 0x2b8   :  { %7694 = vmatprep.subr.mxu1 %v10029_v52  ;;  %v441_v7 = vcombine.low %v376_v60, %v392_v54  ;;  %v8799_v38 = vcombine.high %v8703_v21, %v10029_v52 }
 0x2b9   :  { %v8692_v57 = vpop.permute.xlu1 %305  ;;  %7690 = vmatpush3.xpose.msk.msra.mxu0 %vm2041_vm1, %v2011_v8  ;;  %v974_v8 = vcombine.high %v8525_v17, %v8592_v55  ;;  %v8785_v17 = vrot.slane %v425_v56, %v8221_v18  ;;  %v8788_v55 = vrot.slane %v426_v14, %v8221_v18  ;;  %v8803_v14 = vcombine.high %v8737_v24, %v10029_v52 }
 0x2ba   :  { %7685 = vmatmul.mubr.msk.f32.vlgmr.msra.gmra.mxu1 %vm2041_vm1, %v8590_v51  ;;  %7701 = vmatprep.subr.mxu0 %v10029_v52  ;;  %v1378_v56 = vcombine.high %v8584_v25, %v8587_v50  ;;  %v8824_v28 = vrot.slane %v441_v7, %v8221_v18  ;;  %v670_v7 = vcombine.high %v284_v29, %v8565_v2  ;;  %v282_v32 = vpop.permute.xlu0 %281 }
 0x2bb   :  { %7695 = vmatpush3.xpose.msk.msra.mxu1 %vm2041_vm1, %v2014_v31  ;;  %7698 = vmatprep.mubr.msk.f32.mxu1 %vm8033_vm2, %v10029_v52  ;;  %v685_v31 = vcombine.low %v8528_v19, %v8617_v1 }
 0x2bc   :  { %7692 = vmatmul.mubr.msk.f32.vlgmr.msra.gmra.mxu0 %vm2041_vm1, %v1969_v15  ;;  %7696 = vmatprep.subr.mxu1 %v10029_v52  ;;  %v442_v15 = vcombine.high %v376_v60, %v392_v54  ;;  %v8806_v54 = vrot.slane %v1346_v23, %v8221_v18  ;;  %v8814_v60 = vrot.slane %v974_v8, %v8217_v12  ;;  %v2018_v23 = vld [vmem:[%s10020_s1 + $0x148] sm:$0xff] }
 0x2bd   :  { %v8741_v34 = vpop.permute.xlu1 %317  ;;  %7702 = vmatpush3.xpose.msk.msra.mxu0 %vm2041_vm1, %v2016_v62  ;;  %7705 = vmatprep.mubr.msk.f32.mxu0 %vm8033_vm2, %v10029_v52  ;;  %v8811_v62 = vrot.slane %v973_v13, %v8217_v12  ;;  %v8834_v19 = vrot.slane %v1378_v56, %v8221_v18  ;;  %v7182_v8 = vcombine.low %v8785_v17, %v8788_v55 }
 0x2be   :  { %7703 = vmatprep.subr.mxu0 %v10029_v52  ;;  %v8837_v1 = vrot.slane %v442_v15, %v8221_v18  ;;  %v481_v56 = vcombine.low %v8651_v39, %v8741_v34  ;;  %v482_v15 = vcombine.high %v8651_v39, %v8741_v34  ;;  %v2017_v39 = vld [vmem:[%s10020_s1 + $0x140] sm:$0xff]  ;;  %v465_v34 = vcombine.low %v282_v32, %v8692_v57 }
 0x2bf   :  { %7697 = vmatpush3.xpose.msk.msra.mxu1 %vm2041_vm1, %v2013_v59  ;;  %v669_v59 = vcombine.low %v284_v29, %v8565_v2  ;;  %v7184_v29 = vcombine.high %v8785_v17, %v8788_v55 }
 0x2c0   :  { %7708 = vmatprep.subr.mxu1 %v10029_v52  ;;  %v489_v44 = vrot.slane %v481_v56, %v8217_v12  ;;  %v496_v2 = vrot.slane %v482_v15, %v8217_v12  ;;  %v288_v56 = vpop.permute.xlu0 %287  ;;  %v473_v11 = vrot.slane %v465_v34, %v8217_v12 }
 0x2c1   :  { %v8780_v30 = vpop.permute.xlu1 %299  ;;  %7704 = vmatpush3.xpose.msk.msra.mxu0 %vm2041_vm1, %v2015_v37  ;;  %v693_v37 = vrot.slane %v685_v31, %v8217_v12  ;;  %v677_v31 = vrot.slane %v669_v59, %v8217_v12 }
 0x2c2   :  { %7699 = vmatmul.mubr.msk.f32.vlgmr.msra.gmra.mxu1 %vm2041_vm1, %v8597_v45  ;;  %7715 = vmatprep.subr.mxu0 %v10029_v52  ;;  %v497_v34 = vcombine.low %v473_v11, %v489_v44 }
 0x2c3   :  { %7709 = vmatpush3.xpose.msk.msra.mxu1 %vm2041_vm1, %v2018_v23  ;;  %v466_v23 = vcombine.high %v282_v32, %v8692_v57  ;;  %7712 = vmatprep.mubr.msk.f32.mxu1 %vm8033_vm2, %v10029_v52  ;;  %v701_v55 = vcombine.low %v677_v31, %v693_v37  ;;  %v702_v59 = vcombine.high %v677_v31, %v693_v37  ;;  %v2019_v32 = vld [vmem:[%s10020_s1 + $0x150] sm:$0xff] }
 0x2c4   :  { %7706 = vmatmul.mubr.msk.f32.vlgmr.msra.gmra.mxu0 %vm2041_vm1, %v8672_v33  ;;  %7710 = vmatprep.subr.mxu1 %v10029_v52  ;;  %v7186_v33 = vcombine.low %v8824_v28, %v8837_v1  ;;  %v684_v57 = vrot.slane %v670_v7, %v8217_v12  ;;  %v989_v37 = vcombine.low %v8409_v27, %v8434_v35  ;;  %v2022_v7 = vld [vmem:[%s10020_s1 + $0x168] sm:$0xff] }
 0x2c5   :  { %v8827_v25 = vpop.permute.xlu1 %311  ;;  %7716 = vmatpush3.xpose.msk.msra.mxu0 %vm2041_vm1, %v2020_v3  ;;  %7719 = vmatprep.mubr.msk.f32.mxu0 %vm8033_vm2, %v10029_v52  ;;  %v480_v3 = vrot.slane %v466_v23, %v8217_v12  ;;  %v709_v31 = vrot.slane %v701_v55, %v8221_v18  ;;  %v716_v13 = vrot.slane %v702_v59, %v8221_v18 }
 0x2c6   :  { %7717 = vmatprep.subr.mxu0 %v10029_v52  ;;  %v717_v15 = vcombine.low %v684_v57, %v700_v6  ;;  %v1077_v0 = vcombine.low %v288_v56, %v8827_v25  ;;  %v8913_v55 = vrot.slane %v7182_v8, %v8217_v12 }
 0x2c7   :  { %7711 = vmatpush3.xpose.msk.msra.mxu1 %vm2041_vm1, %v2017_v39  ;;  %v718_v39 = vcombine.high %v684_v57, %v700_v6  ;;  %v2024_v6 = vld [vmem:[%s10020_s1 + $0x178] sm:$0xff]  ;;  %v498_v57 = vcombine.high %v473_v11, %v489_v44  ;;  %v513_v23 = vcombine.low %v480_v3, %v496_v2  ;;  %v514_v59 = vcombine.high %v480_v3, %v496_v2  ;;  %v2021_v11 = vld [vmem:[%s10020_s1 + $0x160] sm:$0xff] }
 0x2c8   :  { %7722 = vmatprep.subr.mxu1 %v10029_v52  ;;  %v8923_v44 = vrot.slane %v7184_v29, %v8217_v12  ;;  %v1085_v2 = vrot.slane %v1077_v0, %v8217_v12  ;;  %v2023_v29 = vld [vmem:[%s10020_s1 + $0x170] sm:$0xff]  ;;  %v505_v3 = vrot.slane %v497_v34, %v8221_v18 }
 0x2c9   :  { %v324_v17 = vpop.permute.xlu1 %323  ;;  %7718 = vmatpush3.xpose.msk.msra.mxu0 %vm2041_vm1, %v2019_v32  ;;  %v10035_v32 = vmov 0.0   ;;  %v732_v8 = vrot.slane %v718_v39, %v8221_v18  ;;  %v8952_v39 = vrot.slane %v7186_v33, %v8217_v12  ;;  %v2028_v33 = vld [vmem:[%s10020_s1 + $0x198] sm:$0xff] }
 0x2ca   :  { %v1093_v50 = vcombine.low %v8780_v30, %v324_v17  ;;  %v1094_v52 = vcombine.high %v8780_v30, %v324_v17  ;;  %7713 = vmatmul.mubr.msk.f32.vlgmr.msra.gmra.mxu1 %vm2041_vm1, %v8600_v46  ;;  %7729 = vmatprep.subr.mxu0 %v10035_v32  ;;  %v1078_v30 = vcombine.high %v288_v56, %v8827_v25 }
 0x2cb   :  { %7723 = vmatpush3.xpose.msk.msra.mxu1 %vm2041_vm1, %v2022_v7  ;;  %v725_v7 = vrot.slane %v717_v15, %v8221_v18  ;;  %v1485_v25 = vcombine.low %v709_v31, %v716_v13  ;;  %v512_v56 = vrot.slane %v498_v57, %v8221_v18  ;;  %v8938_v15 = vrot.slane %v513_v23, %v8221_v18 }
 0x2cc   :  { %v1101_v17 = vrot.slane %v1093_v50, %v8217_v12  ;;  %7720 = vmatmul.mubr.msk.f32.vlgmr.msra.gmra.mxu0 %vm2041_vm1, %v8712_v9  ;;  %7724 = vmatprep.subr.mxu1 %v10035_v32  ;;  %v7199_v50 = vcombine.high %v709_v31, %v716_v13  ;;  %v1108_v9 = vrot.slane %v1094_v52, %v8217_v12  ;;  %v2026_v31 = vld [vmem:[%s10020_s1 + $0x188] sm:$0xff] }
 0x2cd   :  { %7730 = vmatpush3.xpose.msk.msra.mxu0 %vm2041_vm1, %v2024_v6  ;;  %7726 = vmatprep.mubr.msk.f32.mxu1 %vm8033_vm2, %v10035_v32  ;;  %v528_v52 = vrot.slane %v514_v59, %v8221_v18  ;;  %v1092_v0 = vrot.slane %v1078_v30, %v8217_v12  ;;  %v1501_v6 = vcombine.low %v725_v7, %v732_v8 }
 0x2ce   :  { %7731 = vmatprep.subr.mxu0 %v10035_v32  ;;  %v1109_v13 = vcombine.low %v1085_v2, %v1101_v17  ;;  %7733 = vmatprep.mubr.msk.f32.mxu0 %vm8033_vm2, %v10035_v32  ;;  %v7200_v34 = vcombine.high %v725_v7, %v732_v8  ;;  %v1110_v57 = vcombine.high %v1085_v2, %v1101_v17 }
 0x2cf   :  { %7725 = vmatpush3.xpose.msk.msra.mxu1 %vm2041_vm1, %v2021_v11  ;;  %v8956_v23 = vrot.slane %v989_v37, %v8217_v12  ;;  %v1125_v59 = vcombine.low %v1092_v0, %v1108_v9  ;;  %v1126_v30 = vcombine.high %v1092_v0, %v1108_v9  ;;  %v1417_v11 = vcombine.low %v505_v3, %v512_v56  ;;  %v2025_v9 = vld [vmem:[%s10020_s1 + $0x180] sm:$0xff] }
 0x2d0   :  { %7736 = vmatprep.subr.mxu1 %v10035_v32  ;;  %v8968_v37 = vrot.slane %v1485_v25, %v8217_v12  ;;  %v8971_v17 = vrot.slane %v7199_v50, %v8217_v12  ;;  %v7197_v7 = vcombine.high %v505_v3, %v512_v56  ;;  %v1433_v8 = vcombine.low %v8938_v15, %v528_v52 }
 0x2d1   :  { %7732 = vmatpush3.xpose.msk.msra.mxu0 %vm2041_vm1, %v2023_v29  ;;  %v1117_v2 = vrot.slane %v1109_v13, %v8221_v18  ;;  %v1124_v25 = vrot.slane %v1110_v57, %v8221_v18  ;;  %v8986_v50 = vrot.slane %v1501_v6, %v8217_v12  ;;  %v8989_v29 = vrot.slane %v7200_v34, %v8217_v12  ;;  %v2030_v57 = vld [vmem:[%s10020_s1 + $0x1a8] sm:$0xff] }
 0x2d2   :  { %7727 = vmatmul.mubr.msk.f32.vlgmr.msra.gmra.mxu1 %vm2041_vm1, %v8609_v58  ;;  %7743 = vmatprep.subr.mxu0 %v10035_v32  ;;  %v7198_v56 = vcombine.high %v8938_v15, %v528_v52  ;;  %v1133_v0 = vrot.slane %v1125_v59, %v8221_v18  ;;  %v1140_v13 = vrot.slane %v1126_v30, %v8221_v18 }
 0x2d3   :  { %7737 = vmatpush3.xpose.msk.msra.mxu1 %vm2041_vm1, %v2026_v31  ;;  %7740 = vmatprep.mubr.msk.f32.mxu1 %vm8033_vm2, %v10035_v32  ;;  %v2027_v31 = vld [vmem:[%s10020_s1 + $0x190] sm:$0xff]  ;;  %v10037_v6 = vcombine.high %v8409_v27, %v8434_v35  ;;  %v1534_v15 = vcombine.high %v8986_v50, %v8989_v29  ;;  %v10038_v27 = vcombine.low %v8648_v36, %v8721_v26 }
 0x2d4   :  { %7734 = vmatmul.mubr.msk.f32.vlgmr.msra.gmra.mxu0 %vm2041_vm1, %v8716_v20  ;;  %7738 = vmatprep.subr.mxu1 %v10035_v32  ;;  %v10036_v20 = vcombine.high %v8824_v28, %v8837_v1  ;;  %v1518_v1 = vcombine.high %v8968_v37, %v8971_v17  ;;  %v1424_v59 = vrot.slane %v1417_v11, %v8217_v12  ;;  %v2032_v11 = vld [vmem:[%s10020_s1 + $0x1b8] sm:$0xff] }
 0x2d5   :  { %7744 = vmatpush3.xpose.msk.msra.mxu0 %vm2041_vm1, %v2028_v33  ;;  %7747 = vmatprep.mubr.msk.f32.mxu0 %vm8033_vm2, %v10035_v32  ;;  %v9008_v34 = vrot.slane %v10037_v6, %v8217_v12  ;;  %v9023_v35 = vrot.slane %v10038_v27, %v8217_v12  ;;  %v1432_v30 = vrot.slane %v7197_v7, %v8217_v12 }
 0x2d6   :  { %v8995_v3 = vrot.slane %v10036_v20, %v8217_v12  ;;  %7745 = vmatprep.subr.mxu0 %v10035_v32  ;;  %v7219_v20 = vcombine.high %v1117_v2, %v1124_v25  ;;  %v1440_v6 = vrot.slane %v1433_v8, %v8217_v12  ;;  %v1909_v27 = vcombine.low %v1133_v0, %v1140_v13 }
 0x2d7   :  { %7739 = vmatpush3.xpose.msk.msra.mxu1 %vm2041_vm1, %v2025_v9  ;;  %v1893_v9 = vcombine.low %v1117_v2, %v1124_v25  ;;  %v7220_v52 = vcombine.high %v1133_v0, %v1140_v13  ;;  %v1448_v7 = vrot.slane %v7198_v56, %v8217_v12  ;;  %v9046_v8 = vrot.slane %v1518_v1, %v8221_v18  ;;  %v2029_v56 = vld [vmem:[%s10020_s1 + $0x1a0] sm:$0xff] }
 0x2d8   :  { %7750 = vmatprep.subr.mxu1 %v10035_v32  ;;  %v9049_v2 = vrot.slane %v1534_v15, %v8221_v18  ;;  %v1449_v25 = vcombine.low %v1424_v59, %v1432_v30  ;;  %v785_v0 = vcombine.low %v8458_v40, %v8492_v61 }
 0x2d9   :  { %7746 = vmatpush3.xpose.msk.msra.mxu0 %vm2041_vm1, %v2027_v31  ;;  %v1465_v13 = vcombine.low %v1440_v6, %v1448_v7  ;;  %v1450_v31 = vcombine.high %v1424_v59, %v1432_v30  ;;  %v1466_v15 = vcombine.high %v1440_v6, %v1448_v7  ;;  %v1908_v30 = vrot.slane %v7219_v20, %v8217_v12  ;;  %v2034_v20 = vld [vmem:[%s10020_s1 + $0x1c8] sm:$0xff] }
 0x2da   :  { %7741 = vmatmul.mubr.msk.f32.vlgmr.msra.gmra.mxu1 %vm2041_vm1, %v8703_v21  ;;  %7757 = vmatprep.subr.mxu0 %v10035_v32  ;;  %v9063_v1 = vrot.slane %v1449_v25, %v8221_v18  ;;  %v786_v6 = vcombine.high %v8458_v40, %v8492_v61  ;;  %v1924_v7 = vrot.slane %v7220_v52, %v8217_v12 }
 0x2db   :  { %7751 = vmatpush3.xpose.msk.msra.mxu1 %vm2041_vm1, %v2030_v57  ;;  %7754 = vmatprep.mubr.msk.f32.mxu1 %vm8033_vm2, %v10035_v32  ;;  %v1900_v57 = vrot.slane %v1893_v9, %v8217_v12  ;;  %v9071_v33 = vrot.slane %v1465_v13, %v8221_v18  ;;  %v9074_v59 = vrot.slane %v1450_v31, %v8221_v18 }
 0x2dc   :  { %7748 = vmatmul.mubr.msk.f32.vlgmr.msra.gmra.mxu0 %vm2041_vm1, %v8799_v38  ;;  %7752 = vmatprep.subr.mxu1 %v10035_v32  ;;  %v2031_v38 = vld [vmem:[%s10020_s1 + $0x1b0] sm:$0xff]  ;;  %v9082_v9 = vrot.slane %v1466_v15, %v8221_v18  ;;  %v9087_v25 = vcombine.high %v9046_v8, %v9049_v2  ;;  %v793_v13 = vrot.slane %v785_v0, %v8217_v12 }
 0x2dd   :  { %7758 = vmatpush3.xpose.msk.msra.mxu0 %vm2041_vm1, %v2032_v11  ;;  %7761 = vmatprep.mubr.msk.f32.mxu0 %vm8033_vm2, %v10035_v32  ;;  %v1916_v11 = vrot.slane %v1909_v27, %v8217_v12  ;;  %v1925_v40 = vcombine.low %v1900_v57, %v1908_v30  ;;  %v9096_v61 = vcombine.high %v9063_v1, %v9071_v33 }
 0x2de   :  { %7759 = vmatprep.subr.mxu0 %v10035_v32  ;;  %v1926_v27 = vcombine.high %v1900_v57, %v1908_v30  ;;  %v1053_v52 = vcombine.low %v8814_v60, %v9008_v34  ;;  %v9103_v0 = vcombine.high %v9074_v59, %v9082_v9  ;;  %v1054_v15 = vcombine.high %v8814_v60, %v9008_v34  ;;  %v2036_v57 = vld [vmem:[%s10020_s1 + $0x1d8] sm:$0xff] }
 0x2df   :  { %7753 = vmatpush3.xpose.msk.msra.mxu1 %vm2041_vm1, %v2029_v56  ;;  %v1941_v56 = vcombine.low %v1916_v11, %v1924_v7  ;;  %v1942_v31 = vcombine.high %v1916_v11, %v1924_v7  ;;  %v800_v28 = vrot.slane %v786_v6, %v8217_v12  ;;  %v10039_v11 = vcombine.high %v8648_v36, %v8721_v26  ;;  %v2033_v6 = vld [vmem:[%s10020_s1 + $0x1c0] sm:$0xff] }
 0x2e0   :  { %7764 = vmatprep.subr.mxu1 %v10035_v32  ;;  %v1940_v30 = vrot.slane %v1926_v27, %v8221_v18  ;;  %v834_v27 = vcombine.high %v9023_v35, %v793_v13 }
 0x2e1   :  { %7760 = vmatpush3.xpose.msk.msra.mxu0 %vm2041_vm1, %v2031_v38  ;;  %v9114_v38 = vrot.slane %v1925_v40, %v8221_v18  ;;  %v9122_v60 = vrot.slane %v1941_v56, %v8221_v18  ;;  %v1956_v34 = vrot.slane %v1942_v31, %v8221_v18  ;;  %v784_v7 = vrot.slane %v10039_v11, %v8217_v12 }
 0x2e2   :  { %7755 = vmatmul.mubr.msk.f32.vlgmr.msra.gmra.mxu1 %vm2041_vm1, %v8737_v24  ;;  %7771 = vmatprep.subr.mxu0 %v10035_v32  ;;  %v833_v40 = vcombine.low %v9023_v35, %v793_v13  ;;  %v1061_v13 = vrot.slane %v1053_v52, %v8221_v18  ;;  %v1068_v31 = vrot.slane %v1054_v15, %v8221_v18 }
 0x2e3   :  { %7765 = vmatpush3.xpose.msk.msra.mxu1 %vm2041_vm1, %v2034_v20  ;;  %7768 = vmatprep.mubr.msk.f32.mxu1 %vm8033_vm2, %v10035_v32  ;;  %v10040_v20 = vcombine.low %v8811_v62, %v8956_v23  ;;  %v9146_v36 = vcombine.high %v9114_v38, %v9122_v60  ;;  %v9148_v26 = vcombine.low %v1940_v30, %v1956_v34 }
 0x2e4   :  { %7762 = vmatmul.mubr.msk.f32.vlgmr.msra.gmra.mxu0 %vm2041_vm1, %v8803_v14  ;;  %7766 = vmatprep.subr.mxu1 %v10035_v32  ;;  %v10043_v14 = vcombine.high %v8811_v62, %v8956_v23  ;;  %v9160_v11 = vcombine.high %v1940_v30, %v1956_v34  ;;  %v848_v62 = vrot.slane %v834_v27, %v8221_v18  ;;  %v2038_v23 = vld [vmem:[%s10020_s1 + $0x1e8] sm:$0xff] }
 0x2e5   :  { %v1045_v56 = vrot.slane %v10040_v20, %v8221_v18  ;;  %7772 = vmatpush3.xpose.msk.msra.mxu0 %vm2041_vm1, %v2036_v57  ;;  %7775 = vmatprep.mubr.msk.f32.mxu0 %vm8033_vm2, %v10035_v32  ;;  %10041 = vst [vmem:[#allocation6_spill] sm:$0xff] %v9146_v36  ;;  %10042 = vst [vmem:[#allocation7_spill] sm:$0xff] %v9148_v26  ;;  %v2035_v57 = vld [vmem:[%s10020_s1 + $0x1d0] sm:$0xff]  ;;  %v849_v20 = vcombine.low %v784_v7, %v800_v28 }
 0x2e6   :  { %v1052_v35 = vrot.slane %v10043_v14, %v8221_v18  ;;  %7773 = vmatprep.subr.mxu0 %v10035_v32  ;;  %10044 = vst [vmem:[#allocation8_spill] sm:$0xff] %v9160_v11  ;;  %v850_v36 = vcombine.high %v784_v7, %v800_v28  ;;  %v841_v26 = vrot.slane %v833_v40, %v8221_v18 }
 0x2e7   :  { %7767 = vmatpush3.xpose.msk.msra.mxu1 %vm2041_vm1, %v2033_v6  ;;  %v1225_v52 = vcombine.low %v8913_v55, %v8923_v44  ;;  %v1257_v15 = vcombine.low %v8952_v39, %v8995_v3  ;;  %v10045_v28 = vcombine.high %v8523_v16, %v8612_v42  ;;  %v1975_v34 = vcombine.high %v8744_v53, %v10035_v32  ;;  %v2040_v42 = vld [vmem:[%s10020_s1 + $0x1f8] sm:$0xff] }
 0x2e8   :  { %7778 = vmatprep.subr.mxu1 %v10035_v32  ;;  %v10046_v7 = vcombine.low %v8761_v49, %v8764_v5  ;;  %v10047_v27 = vcombine.low %v8774_v22, %v8777_v43  ;;  %v7210_v14 = vcombine.low %v1045_v56, %v1052_v35  ;;  %v7212_v11 = vcombine.high %v1045_v56, %v1052_v35  ;;  %v2037_v35 = vld [vmem:[%s10020_s1 + $0x1e0] sm:$0xff] }
 0x2e9   :  { %v9177_v30 = vrot.slane %v10045_v28, %v8221_v18  ;;  %7774 = vmatpush3.xpose.msk.msra.mxu0 %vm2041_vm1, %v2035_v57  ;;  %v7214_v16 = vcombine.low %v1061_v13, %v1068_v31  ;;  %v7216_v57 = vcombine.high %v1061_v13, %v1068_v31  ;;  %v857_v28 = vrot.slane %v849_v20, %v8221_v18 }
 0x2ea   :  { %v1369_v40 = vrot.slane %v10046_v7, %v8221_v18  ;;  %v1401_v6 = vrot.slane %v10047_v27, %v8221_v18  ;;  %7769 = vmatmul.mubr.msk.f32.vlgmr.msra.gmra.mxu1 %vm2041_vm1, %v8744_v53  ;;  %7785 = vmatprep.subr.mxu0 %v10035_v32  ;;  %v864_v7 = vrot.slane %v850_v36, %v8221_v18 }
 0x2eb   :  { %7779 = vmatpush3.xpose.msk.msra.mxu1 %vm2041_vm1, %v2038_v23  ;;  %7782 = vmatprep.mubr.msk.f32.mxu1 %vm8033_vm2, %v10035_v32  ;;  %v7202_v56 = vcombine.low %v841_v26, %v848_v62  ;;  %v1233_v13 = vrot.slane %v1225_v52, %v8221_v18  ;;  %v1265_v31 = vrot.slane %v1257_v15, %v8221_v18  ;;  %v2039_v52 = vld [vmem:[%s10020_s1 + $0x1f0] sm:$0xff] }
 0x2ec   :  { %7776 = vmatmul.mubr.msk.f32.vlgmr.msra.gmra.mxu0 %vm2041_vm1, %v1975_v34  ;;  %7780 = vmatprep.subr.mxu1 %v10035_v32  ;;  %v1413_v36 = vcombine.low %v1369_v40, %v1401_v6  ;;  %v1414_v20 = vcombine.high %v1369_v40, %v1401_v6  ;;  %v1362_v23 = vcombine.high %v8761_v49, %v8764_v5 }
 0x2ed   :  { %7786 = vmatpush3.xpose.msk.msra.mxu0 %vm2041_vm1, %v2040_v42  ;;  %7789 = vmatprep.mubr.msk.f32.mxu0 %vm8033_vm2, %v10035_v32  ;;  %v9214_v34 = vrot.slane %v7210_v14, %v8217_v12  ;;  %v9217_v27 = vrot.slane %v7212_v11, %v8217_v12  ;;  %v1976_v15 = vcombine.high %v9177_v30, %v10035_v32 }
 0x2ee   :  { %7787 = vmatprep.subr.mxu0 %v10035_v32  ;;  %v1394_v40 = vcombine.high %v8774_v22, %v8777_v43  ;;  %v9228_v49 = vrot.slane %v7214_v16, %v8217_v12  ;;  %v9231_v5 = vrot.slane %v7216_v57, %v8217_v12  ;;  %v7204_v11 = vcombine.high %v841_v26, %v848_v62 }
 0x2ef   :  { %v7206_v6 = vcombine.low %v857_v28, %v864_v7  ;;  %7781 = vmatpush3.xpose.msk.msra.mxu1 %vm2041_vm1, %v2037_v35  ;;  %v9235_v14 = vrot.slane %v7202_v56, %v8217_v12  ;;  %v7208_v42 = vcombine.high %v857_v28, %v864_v7  ;;  %v1277_v32 = vcombine.low %v1233_v13, %v1265_v31 }
 0x2f0   :  { %7792 = vmatprep.subr.msk.mxu1 %vm2041_vm1, %v1413_v36  ;;  %v7201_v22 = vcombine.low %v8590_v51, %v8597_v45  ;;  %v1376_v43 = vrot.slane %v1362_v23, %v8221_v18  ;;  %v7203_v26 = vcombine.high %v8590_v51, %v8597_v45  ;;  %v7205_v62 = vcombine.low %v8600_v46, %v8609_v58 }
 0x2f1   :  { %7788 = vmatpush3.xpose.msk.msra.mxu0 %vm2041_vm1, %v2039_v52  ;;  %v7207_v16 = vcombine.high %v8600_v46, %v8609_v58  ;;  %v1408_v57 = vrot.slane %v1394_v40, %v8221_v18  ;;  %v1226_v28 = vcombine.high %v8913_v55, %v8923_v44  ;;  %v1258_v7 = vcombine.high %v8952_v39, %v8995_v3 }
 0x2f2   :  { %7783 = vmatmul.mubr.msk.f32.vlgmr.msra.gmra.mxu1 %vm2041_vm1, %v9177_v30  ;;  %7799 = vmatprep.subr.msk.mxu0 %vm2041_vm1, %v1414_v20  ;;  %v9257_v51 = vrot.slane %v7204_v11, %v8217_v12  ;;  %v9260_v45 = vrot.slane %v7206_v6, %v8217_v12  ;;  %v10048_v46 = vcombine.low %v8478_v47, %v8505_v48 }
 0x2f3   :  { %7793 = vmatpush3.xpose.msk.msra.mxu1 %vm2041_vm1, %v1413_v36  ;;  %v1278_v58 = vcombine.high %v1233_v13, %v1265_v31  ;;  %v1769_v55 = vcombine.low %v9214_v34, %v9217_v27  ;;  %v1801_v44 = vcombine.low %v9228_v49, %v9231_v5  ;;  %v9274_v39 = vrot.slane %v7201_v22, %v8217_v12 }
 0x2f4   :  { %7796 = vmatprep.mubr.msk.f32.mxu1 %vm2041_vm1, %v10048_v46  ;;  %7790 = vmatmul.mubr.msk.f32.vlgmr.msra.gmra.mxu0 %vm2041_vm1, %v1976_v15  ;;  %v10049_v3 = vcombine.high %v8478_v47, %v8505_v48  ;;  %v9282_v56 = vrot.slane %v7203_v26, %v8217_v12  ;;  %v9285_v35 = vrot.slane %v7205_v62, %v8217_v12 }
 0x2f5   :  { %7794 = vmatprep.subr.msk.mxu1 %vm2041_vm1, %v1277_v32  ;;  %7800 = vmatpush3.xpose.msk.msra.mxu0 %vm2041_vm1, %v1414_v20  ;;  %v9288_v13 = vrot.slane %v7207_v16, %v8217_v12  ;;  %v9291_v31 = vrot.slane %v7208_v42, %v8217_v12  ;;  %v1415_v36 = vcombine.low %v1376_v43, %v1408_v57 }
 0x2f6   :  { %7803 = vmatprep.mubr.msk.f32.mxu0 %vm2041_vm1, %v10049_v3  ;;  %7801 = vmatprep.subr.msk.mxu0 %vm2041_vm1, %v1278_v58  ;;  %v1240_v20 = vrot.slane %v1226_v28, %v8221_v18  ;;  %v1272_v47 = vrot.slane %v1258_v7, %v8221_v18  ;;  %v7209_v48 = vcombine.low %v8703_v21, %v8737_v24 }
 0x2f7   :  { %v7211_v23 = vcombine.high %v8703_v21, %v8737_v24  ;;  %v7213_v52 = vcombine.low %v8744_v53, %v9177_v30  ;;  %7795 = vmatpush3.xpose.msk.msra.mxu1 %vm2041_vm1, %v1277_v32  ;;  %v7215_v15 = vcombine.high %v8744_v53, %v9177_v30  ;;  %v1416_v40 = vcombine.high %v1376_v43, %v1408_v57 }
 0x2f8   :  { %7806 = vmatprep.subr.msk.mxu1 %vm2041_vm1, %v1415_v36  ;;  %v1777_v11 = vrot.slane %v1769_v55, %v8221_v18  ;;  %v1809_v6 = vrot.slane %v1801_v44, %v8221_v18  ;;  %v1617_v21 = vcombine.low %v9274_v39, %v9282_v56  ;;  %v1649_v24 = vcombine.low %v9285_v35, %v9288_v13 }
 0x2f9   :  { %7802 = vmatpush3.xpose.msk.msra.mxu0 %vm2041_vm1, %v1278_v58  ;;  %v10050_v42 = vcombine.low %v8654_v41, %v8657_v10  ;;  %v1279_v53 = vcombine.low %v1240_v20, %v1272_v47  ;;  %v1633_v30 = vcombine.low %v9235_v14, %v9257_v51  ;;  %v1665_v32 = vcombine.low %v9260_v45, %v9291_v31 }
 0x2fa   :  { %7813 = vmatprep.subr.msk.mxu0 %vm2041_vm1, %v1416_v40  ;;  %v9323_v22 = vrot.slane %v7209_v48, %v8217_v12  ;;  %v9326_v43 = vrot.slane %v7211_v23, %v8217_v12  ;;  %v9329_v26 = vrot.slane %v7213_v52, %v8217_v12  ;;  %v10051_v62 = vcombine.low %v8695_v63, %v8698_v4 }
 0x2fb   :  { %7797 = vmatmul.mubr.msk.f32.vlgmr.msra.gmra.mxu1 %vm2041_vm1, %v10050_v42  ;;  %v9337_v16 = vrot.slane %v7215_v15, %v8217_v12  ;;  %v10052_v57 = vcombine.high %v8654_v41, %v8657_v10  ;;  %v1280_v28 = vcombine.high %v1240_v20, %v1272_v47  ;;  %v1770_v7 = vcombine.high %v9214_v34, %v9217_v27 }
 0x2fc   :  { %7807 = vmatpush3.xpose.msk.msra.mxu1 %vm2041_vm1, %v1415_v36  ;;  %7810 = vmatprep.mubr.msk.f32.mxu1 %vm2041_vm1, %v10051_v62  ;;  %v10053_v46 = vcombine.high %v8695_v63, %v8698_v4  ;;  %v1625_v58 = vrot.slane %v1617_v21, %v8221_v18  ;;  %v1657_v55 = vrot.slane %v1649_v24, %v8221_v18 }
 0x2fd   :  { %7804 = vmatmul.mubr.msk.f32.vlgmr.msra.gmra.mxu0 %vm2041_vm1, %v10052_v57  ;;  %7808 = vmatprep.subr.msk.mxu1 %vm2041_vm1, %v1279_v53  ;;  %v1802_v41 = vcombine.high %v9228_v49, %v9231_v5  ;;  %v1821_v10 = vcombine.low %v1777_v11, %v1809_v6  ;;  %v1641_v44 = vrot.slane %v1633_v30, %v8221_v18 }
 0x2fe   :  { %7814 = vmatpush3.xpose.msk.msra.mxu0 %vm2041_vm1, %v1416_v40  ;;  %7817 = vmatprep.mubr.msk.f32.mxu0 %vm2041_vm1, %v10053_v46  ;;  %v1673_v34 = vrot.slane %v1665_v32, %v8221_v18  ;;  %v1822_v63 = vcombine.high %v1777_v11, %v1809_v6  ;;  %v1784_v4 = vrot.slane %v1770_v7, %v8221_v18 }
 0x2ff   :  { %7815 = vmatprep.subr.msk.mxu0 %vm2041_vm1, %v1280_v28  ;;  %v1753_v27 = vcombine.low %v9323_v22, %v9326_v43  ;;  %v1785_v49 = vcombine.low %v9329_v26, %v9337_v16  ;;  %v1681_v5 = vcombine.low %v1625_v58, %v1657_v55  ;;  %v1816_v3 = vrot.slane %v1802_v41, %v8221_v18 }
 0x300   :  { %7809 = vmatpush3.xpose.msk.msra.mxu1 %vm2041_vm1, %v1279_v53  ;;  %v1618_v36 = vcombine.high %v9274_v39, %v9282_v56  ;;  %v1650_v20 = vcombine.high %v9285_v35, %v9288_v13  ;;  %v10054_v47 = vcombine.low %v8806_v54, %v8834_v19  ;;  %v1685_v48 = vcombine.low %v1641_v44, %v1673_v34 }
 0x301   :  { %7820 = vmatprep.subr.msk.mxu1 %vm2041_vm1, %v1821_v10  ;;  %v1634_v23 = vcombine.high %v9235_v14, %v9257_v51  ;;  %v1666_v52 = vcombine.high %v9260_v45, %v9291_v31  ;;  %v1682_v39 = vcombine.high %v1625_v58, %v1657_v55  ;;  %v10055_v56 = vcombine.high %v8806_v54, %v8834_v19 }
 0x302   :  { %7816 = vmatpush3.xpose.msk.msra.mxu0 %vm2041_vm1, %v1280_v28  ;;  %v1686_v35 = vcombine.high %v1641_v44, %v1673_v34  ;;  %v1761_v13 = vrot.slane %v1753_v27, %v8221_v18  ;;  %v1793_v14 = vrot.slane %v1785_v49, %v8221_v18  ;;  %v1823_v51 = vcombine.low %v1784_v4, %v1816_v3 }
 0x303   :  { %7811 = vmatmul.mubr.msk.f32.vlgmr.msra.gmra.mxu1 %vm2041_vm1, %v10054_v47  ;;  %7827 = vmatprep.subr.msk.mxu0 %vm2041_vm1, %v1822_v63  ;;  %v1632_v45 = vrot.slane %v1618_v36, %v8221_v18  ;;  %v1664_v31 = vrot.slane %v1650_v20, %v8221_v18  ;;  %v1648_v54 = vrot.slane %v1634_v23, %v8221_v18 }
 0x304   :  { %7821 = vmatpush3.xpose.msk.msra.mxu1 %vm2041_vm1, %v1821_v10  ;;  %7824 = vmatprep.mubr.msk.f32.mxu1 %vm2041_vm1, %v1681_v5  ;;  %v1680_v19 = vrot.slane %v1666_v52, %v8221_v18  ;;  %v1517_v15 = vcombine.low %v8968_v37, %v8971_v17  ;;  %v1533_v40 = vcombine.low %v8986_v50, %v8989_v29 }
 0x305   :  { %7818 = vmatmul.mubr.msk.f32.vlgmr.msra.gmra.mxu0 %vm2041_vm1, %v10055_v56  ;;  %7822 = vmatprep.subr.msk.mxu1 %vm2041_vm1, %v1685_v48  ;;  %v1817_v11 = vcombine.low %v1761_v13, %v1793_v14  ;;  %v1824_v6 = vcombine.high %v1784_v4, %v1816_v3  ;;  %v1754_v21 = vcombine.high %v9323_v22, %v9326_v43 }
 0x306   :  { %7828 = vmatpush3.xpose.msk.msra.mxu0 %vm2041_vm1, %v1822_v63  ;;  %7831 = vmatprep.mubr.msk.f32.mxu0 %vm2041_vm1, %v1682_v39  ;;  %v1786_v24 = vcombine.high %v9329_v26, %v9337_v16  ;;  %v1683_v42 = vcombine.low %v1632_v45, %v1664_v31  ;;  %v1818_v53 = vcombine.high %v1761_v13, %v1793_v14 }
 0x307   :  { %7829 = vmatprep.subr.msk.mxu0 %vm2041_vm1, %v1686_v35  ;;  %v1687_v37 = vcombine.low %v1648_v54, %v1680_v19  ;;  %v1525_v17 = vrot.slane %v1517_v15, %v8221_v18  ;;  %v1541_v50 = vrot.slane %v1533_v40, %v8221_v18  ;;  %v1684_v29 = vcombine.high %v1632_v45, %v1664_v31 }
 0x308   :  { %7823 = vmatpush3.xpose.msk.msra.mxu1 %vm2041_vm1, %v1685_v48  ;;  %v1688_v30 = vcombine.high %v1648_v54, %v1680_v19  ;;  %v1768_v32 = vrot.slane %v1754_v21, %v8221_v18  ;;  %v1800_v22 = vrot.slane %v1786_v24, %v8221_v18  ;;  %v1551_v62 = vcombine.low %v9046_v8, %v9049_v2 }
 0x309   :  { %7834 = vmatprep.subr.msk.mxu1 %vm2041_vm1, %v1823_v51  ;;  %v1549_v43 = vcombine.low %v1525_v17, %v1541_v50  ;;  %v1481_v57 = vcombine.low %v9063_v1, %v9071_v33  ;;  %v9428_v28 = vcombine.high %v1525_v17, %v1541_v50  ;;  %v1483_v7 = vcombine.low %v9074_v59, %v9082_v9 }
 0x30a   :  { %7830 = vmatpush3.xpose.msk.msra.mxu0 %vm2041_vm1, %v1686_v35  ;;  %v1819_v26 = vcombine.low %v1768_v32, %v1800_v22  ;;  %v1820_v16 = vcombine.high %v1768_v32, %v1800_v22  ;;  %v9435_v8 = vcombine.low %v9114_v38, %v9122_v60 }
 0x30b   :  { %7825 = vmatmul.mubr.msk.f32.vlgmr.msra.gmra.mxu1 %vm2041_vm1, %v1817_v11  ;;  %7841 = vmatprep.subr.msk.mxu0 %vm2041_vm1, %v1824_v6 }
 0x30c   :  { %7835 = vmatpush3.xpose.msk.msra.mxu1 %vm2041_vm1, %v1823_v51  ;;  %7838 = vmatprep.mubr.msk.f32.mxu1 %vm2041_vm1, %v1683_v42 }
 0x30d   :  { %7832 = vmatmul.mubr.msk.f32.vlgmr.msra.gmra.mxu0 %vm2041_vm1, %v1818_v53  ;;  %7836 = vmatprep.subr.msk.mxu1 %vm2041_vm1, %v1687_v37 }
 0x30e   :  { %7842 = vmatpush3.xpose.msk.msra.mxu0 %vm2041_vm1, %v1824_v6  ;;  %7845 = vmatprep.mubr.msk.f32.mxu0 %vm2041_vm1, %v1684_v29 }
 0x30f   :  { %7843 = vmatprep.subr.msk.mxu0 %vm2041_vm1, %v1688_v30 }
 0x310   :  { %7837 = vmatpush3.xpose.msk.msra.mxu1 %vm2041_vm1, %v1687_v37 }
 0x311   :  { %7848 = vmatprep.subr.mxu1 %v1549_v43 }
 0x312   :  { %7844 = vmatpush3.xpose.msk.msra.mxu0 %vm2041_vm1, %v1688_v30 }
 0x313   :  { %7839 = vmatmul.mubr.msk.f32.vlgmr.msra.gmra.mxu1 %vm2041_vm1, %v1819_v26  ;;  %7862 = vmatprep.subr.mxu0 %v1551_v62 }
 0x314   :  { %7849 = vmatpush3.msra.mxu1 %v1549_v43 }
 0x315   :  { %7846 = vmatmul.mubr.msk.f32.vlgmr.msra.gmra.mxu0 %vm2041_vm1, %v1820_v16  ;;  %7850 = vmatprep.subr.mxu1 %v1481_v57 }
 0x316   :  { %7851 = vmatpush3.msra.mxu1 %v1481_v57  ;;  %7863 = vmatpush3.msra.mxu0 %v1551_v62 }
 0x317   :  { %7855 = vmatprep.subr.mxu1 %v9428_v28  ;;  %7864 = vmatprep.subr.mxu0 %v1483_v7 }
 0x318   :  { %7865 = vmatpush3.msra.mxu0 %v1483_v7 }
 0x319   :  { %7876 = vmatprep.subr.mxu0 %v9435_v8 }
 0x33a   :  { %v2117_v33 = vpop.f32.mrf.mxu1 }
 0x33c   :  { %v7574_v2 = vpop.f32.mrf.mxu1  ;;  %v2196_v1 = vpop.f32.mrf.mxu0 }
 0x33e   :  { %v7581_v46 = vpop.f32.mrf.mxu0 }
 0x342   :  { %v2275_v58 = vpop.f32.mrf.mxu1 }
 0x343   :  { %v4570_v55 = vcombine.low %v2117_v33, %v2275_v58 }
 0x344   :  { %v7588_v41 = vpop.f32.mrf.mxu1  ;;  %v2354_v59 = vpop.f32.mrf.mxu0 }
 0x345   :  { %v4578_v9 = vcombine.low %v2196_v1, %v2354_v59  ;;  %v4577_v44 = vrot.slane %v4570_v55, %v8217_v12 }
 0x346   :  { %v7595_v10 = vpop.f32.mrf.mxu0 }
 0x347   :  { %v4585_v34 = vrot.slane %v4578_v9, %v8217_v12 }
 0x349   :  { %v4602_v63 = vcombine.low %v4577_v44, %v4585_v34  ;;  %v4603_v38 = vcombine.high %v4577_v44, %v4585_v34 }
 0x34a   :  { %v2433_v60 = vpop.f32.mrf.mxu1 }
 0x34b   :  { %v9443_v13 = vrot.slane %v4602_v63, %v8221_v18  ;;  %v9449_v51 = vrot.slane %v4603_v38, %v8221_v18 }
 0x34c   :  { %v7602_v4 = vpop.f32.mrf.mxu1  ;;  %v2512_v27 = vpop.f32.mrf.mxu0 }
 0x34e   :  { %v7609_v49 = vpop.f32.mrf.mxu0 }
 0x352   :  { %v2591_v5 = vpop.f32.mrf.mxu1 }
 0x353   :  { %v4586_v3 = vcombine.low %v2433_v60, %v2591_v5 }
 0x354   :  { %v7616_v36 = vpop.f32.mrf.mxu1  ;;  %v2670_v20 = vpop.f32.mrf.mxu0 }
 0x355   :  { %v4594_v47 = vcombine.low %v2512_v27, %v2670_v20  ;;  %v4593_v23 = vrot.slane %v4586_v3, %v8217_v12 }
 0x356   :  { %v7623_v48 = vpop.f32.mrf.mxu0 }
 0x357   :  { %v4601_v52 = vrot.slane %v4594_v47, %v8217_v12 }
 0x359   :  { %v4618_v39 = vcombine.low %v4593_v23, %v4601_v52  ;;  %v4619_v56 = vcombine.high %v4593_v23, %v4601_v52 }
 0x35a   :  { %v2749_v35 = vpop.f32.mrf.mxu1 }
 0x35b   :  { %v9446_v14 = vrot.slane %v4618_v39, %v8221_v18  ;;  %v9452_v45 = vrot.slane %v4619_v56, %v8221_v18 }
 0x35c   :  { %v7630_v31 = vpop.f32.mrf.mxu1  ;;  %v2828_v54 = vpop.f32.mrf.mxu0 }
 0x35d   :  { %v4634_v19 = vcombine.low %v9443_v13, %v9446_v14  ;;  %v4635_v15 = vcombine.high %v9443_v13, %v9446_v14  ;;  %v4636_v40 = vcombine.low %v9449_v51, %v9452_v45  ;;  %v4637_v11 = vcombine.high %v9449_v51, %v9452_v45  ;;  %v9585_v51 = vld [vmem:[%s10021_s2 + $0x30] sm:$0xff] }
 0x35e   :  { %v7637_v6 = vpop.f32.mrf.mxu0  ;;  %vm5769_vm8 = vcmp.lt.f32.partialorder %v9585_v51, 0.0 }
 0x362   :  { %v2907_v21 = vpop.f32.mrf.mxu1 }
 0x363   :  { %v4638_v24 = vcombine.low %v2749_v35, %v2907_v21 }
 0x364   :  { %v7644_v42 = vpop.f32.mrf.mxu1  ;;  %v2986_v53 = vpop.f32.mrf.mxu0 }
 0x365   :  { %v4646_v37 = vcombine.low %v2828_v54, %v2986_v53  ;;  %v4645_v50 = vrot.slane %v4638_v24, %v8217_v12 }
 0x366   :  { %v7651_v17 = vpop.f32.mrf.mxu0 }
 0x367   :  { %v4653_v29 = vrot.slane %v4646_v37, %v8217_v12 }
 0x369   :  { %v4670_v30 = vcombine.low %v4645_v50, %v4653_v29  ;;  %v4671_v32 = vcombine.high %v4645_v50, %v4653_v29 }
 0x36a   :  { %v3065_v22 = vpop.f32.mrf.mxu1 }
 0x36b   :  { %v4678_v9 = vrot.slane %v4670_v30, %v8221_v18  ;;  %v9469_v44 = vrot.slane %v4671_v32, %v8221_v18 }
 0x36c   :  { %v7658_v43 = vpop.f32.mrf.mxu1  ;;  %v3144_v26 = vpop.f32.mrf.mxu0 }
 0x36e   :  { %v7665_v62 = vpop.f32.mrf.mxu0 }
 0x372   :  { %v3223_v16 = vpop.f32.mrf.mxu1 }
 0x373   :  { %v4654_v57 = vcombine.low %v3065_v22, %v3223_v16 }
 0x374   :  { %v7672_v7 = vpop.f32.mrf.mxu1  ;;  %v3302_v33 = vpop.f32.mrf.mxu0 }
 0x375   :  { %v4662_v2 = vcombine.low %v3144_v26, %v3302_v33  ;;  %v4661_v46 = vrot.slane %v4654_v57, %v8217_v12 }
 0x376   :  { %v7679_v1 = vpop.f32.mrf.mxu0 }
 0x377   :  { %v4669_v58 = vrot.slane %v4662_v2, %v8217_v12 }
 0x379   :  { %v4686_v55 = vcombine.low %v4661_v46, %v4669_v58  ;;  %v4687_v41 = vcombine.high %v4661_v46, %v4669_v58 }
 0x37a   :  { %v3381_v59 = vpop.f32.mrf.mxu1 }
 0x37b   :  { %v4694_v10 = vrot.slane %v4686_v55, %v8221_v18  ;;  %v9472_v34 = vrot.slane %v4687_v41, %v8221_v18 }
 0x37c   :  { %v7686_v63 = vpop.f32.mrf.mxu1  ;;  %v3460_v38 = vpop.f32.mrf.mxu0 }
 0x37d   :  { %v4702_v60 = vcombine.low %v4678_v9, %v4694_v10  ;;  %v4703_v4 = vcombine.high %v4678_v9, %v4694_v10  ;;  %v4704_v27 = vcombine.low %v9469_v44, %v9472_v34  ;;  %v4705_v49 = vcombine.high %v9469_v44, %v9472_v34 }
 0x37e   :  { %v7693_v5 = vpop.f32.mrf.mxu0 }
 0x382   :  { %v3539_v3 = vpop.f32.mrf.mxu1 }
 0x383   :  { %v4706_v36 = vcombine.low %v3381_v59, %v3539_v3  ;;  %v9491_v3 = vld [vmem:[%s10021_s2 + $0x8] sm:$0xff] }
 0x384   :  { %v7700_v20 = vpop.f32.mrf.mxu1  ;;  %v3618_v47 = vpop.f32.mrf.mxu0  ;;  %vm5764_vm5 = vcmp.lt.f32.partialorder %v9491_v3, 0.0 }
 0x385   :  { %v4714_v48 = vcombine.low %v3460_v38, %v3618_v47  ;;  %v9479_v52 = vrot.slane %v4706_v36, %v8217_v12 }
 0x386   :  { %v7707_v23 = vpop.f32.mrf.mxu0 }
 0x387   :  { %v9482_v39 = vrot.slane %v4714_v48, %v8217_v12 }
 0x389   :  { %v4738_v56 = vcombine.low %v9479_v52, %v9482_v39  ;;  %v4739_v35 = vcombine.high %v9479_v52, %v9482_v39 }
 0x38a   :  { %v3697_v31 = vpop.f32.mrf.mxu1 }
 0x38c   :  { %v7714_v54 = vpop.f32.mrf.mxu1  ;;  %v3776_v6 = vpop.f32.mrf.mxu0 }
 0x38e   :  { %v7721_v21 = vpop.f32.mrf.mxu0 }
 0x38f   :  { %v9508_v21 = vld [vmem:[%s10021_s2] sm:$0xff] }
 0x390   :  { %vm5763_vm4 = vcmp.lt.f32.partialorder %v9508_v21, 0.0 }
 0x392   :  { %v3855_v24 = vpop.f32.mrf.mxu1 }
 0x393   :  { %v4722_v23 = vcombine.low %v3697_v31, %v3855_v24 }
 0x394   :  { %v7728_v42 = vpop.f32.mrf.mxu1  ;;  %v3934_v53 = vpop.f32.mrf.mxu0 }
 0x395   :  { %v4730_v10 = vcombine.low %v3776_v6, %v3934_v53 }
 0x396   :  { %v7735_v37 = vpop.f32.mrf.mxu0 }
 0x397   :  { %v9517_v31 = vrot.slane %v4730_v10, %v8217_v12  ;;  %v9523_v37 = vld [vmem:[%s10021_s2 + $0x18] sm:$0xff] }
 0x398   :  { %vm5766_vm7 = vcmp.lt.f32.partialorder %v9523_v37, 0.0 }
 0x39a   :  { %v4013_v17 = vpop.f32.mrf.mxu1 }
 0x39c   :  { %v7742_v50 = vpop.f32.mrf.mxu1  ;;  %v4092_v29 = vpop.f32.mrf.mxu0 }
 0x39e   :  { %v7749_v30 = vpop.f32.mrf.mxu0 }
 0x3a2   :  { %v4171_v32 = vpop.f32.mrf.mxu1 }
 0x3a3   :  { %v4774_v63 = vcombine.low %v4013_v17, %v4171_v32 }
 0x3a4   :  { %v7756_v22 = vpop.f32.mrf.mxu1  ;;  %v4250_v43 = vpop.f32.mrf.mxu0 }
 0x3a5   :  { %v4782_v55 = vcombine.low %v4092_v29, %v4250_v43  ;;  %v4781_v24 = vrot.slane %v4774_v63, %v8217_v12 }
 0x3a6   :  { %v7763_v26 = vpop.f32.mrf.mxu0 }
 0x3a7   :  { %v9547_v26 = vld [vmem:[%s10021_s2 + $0x10] sm:$0xff] }
 0x3a8   :  { %vm5765_vm6 = vcmp.lt.f32.partialorder %v9547_v26, 0.0 }
 0x3aa   :  { %v4329_v62 = vpop.f32.mrf.mxu1 }
 0x3ac   :  { %v7770_v16 = vpop.f32.mrf.mxu1  ;;  %v4408_v57 = vpop.f32.mrf.mxu0 }
 0x3ae   :  { %v7777_v7 = vpop.f32.mrf.mxu0 }
 0x3b2   :  { %v4487_v33 = vpop.f32.mrf.mxu1 }
 0x3b3   :  { %v4790_v41 = vcombine.low %v4329_v62, %v4487_v33 }
 0x3b4   :  { %v7784_v2 = vpop.f32.mrf.mxu1  ;;  %v4566_v1 = vpop.f32.mrf.mxu0 }
 0x3b5   :  { %v4798_v58 = vcombine.low %v4408_v57, %v4566_v1  ;;  %v9503_v54 = vrot.slane %v4790_v41, %v8217_v12  ;;  %v9575_v41 = vld [vmem:[%s10021_s2 + $0x28] sm:$0xff] }
 0x3b6   :  { %v7791_v46 = vpop.f32.mrf.mxu0  ;;  %vm5768_vm10 = vcmp.lt.f32.partialorder %v9575_v41, 0.0 }
 0x3b7   :  { %v9494_v36 = vrot.slane %v4798_v58, %v8217_v12  ;;  %v9559_v46 = vld [vmem:[%s10021_s2 + $0x38] sm:$0xff] }
 0x3b8   :  { %vm5770_vm12 = vcmp.lt.f32.partialorder %v9559_v46, 0.0 }
 0x3b9   :  { %v4822_v17 = vcombine.low %v9503_v54, %v9494_v36  ;;  %v4823_v45 = vcombine.high %v9503_v54, %v9494_v36 }
 0x3bb   :  { %v7798_v59 = vpop.f32.mrf.mxu1  ;;  %v4830_v7 = vrot.slane %v4822_v17, %v8221_v18  ;;  %v4837_v17 = vrot.slane %v4823_v45, %v8221_v18 }
 0x3bc   :  { %v4942_v9 = vadd.f32 %v7798_v59, %v4702_v60  ;;  %v9500_v60 = vrot.slane %v4782_v55, %v8217_v12  ;;  %v4746_v59 = vrot.slane %v4738_v56, %v8221_v18 }
 0x3bd   :  { %v4936_v38 = vpop.f32.mrf.mxu1  ;;  %v7805_v5 = vpop.f32.mrf.mxu0 }
 0x3be   :  { %v5555_v20 = vmul.f32 0.35355338, %v4942_v9  ;;  %v4937_v47 = vadd.f32 %v4936_v38, %v4634_v19  ;;  %v5029_v48 = vadd.f32 %v7805_v5, %v4703_v4  ;;  %v4806_v50 = vcombine.low %v4781_v24, %v9500_v60 }
 0x3bf   :  { %v5023_v6 = vpop.f32.mrf.mxu0  ;;  %v4807_v63 = vcombine.high %v4781_v24, %v9500_v60 }
 0x3c0   :  { %v5554_v42 = vmul.f32 0.35355338, %v4937_v47  ;;  %v5557_v53 = vmul.f32 0.35355338, %v5029_v48  ;;  %v5024_v19 = vadd.f32 %v5023_v6, %v4635_v15  ;;  %v9514_v4 = vadd.f32 %v5555_v20, %v9491_v3 }
 0x3c1   :  { %v9533_v15 = vrot.slane %v4722_v23, %v8217_v12  ;;  %v4814_v1 = vrot.slane %v4806_v50, %v8221_v18 }
 0x3c2   :  { %v5590_v13 = vsel %vm5586_vm3, %v9514_v4, -inf  ;;  %v9530_v14 = vadd.f32 %v5554_v42, %v9508_v21  ;;  %v5556_v29 = vmul.f32 0.35355338, %v5024_v19  ;;  %v9542_v43 = vadd.f32 %v5557_v53, %v9523_v37  ;;  %v9606_v42 = vld [vmem:[%s10021_s2 + $0x20] sm:$0xff] }
 0x3c3   :  { %5591 = vmax.xlane.f32.xlu1 %v5590_v13  ;;  %v7812_v30 = vpop.f32.mrf.mxu1  ;;  %v4754_v62 = vcombine.low %v9533_v15, %v9517_v31  ;;  %v4838_v9 = vcombine.low %v4814_v1, %v4830_v7  ;;  %v4839_v5 = vcombine.high %v4814_v1, %v4830_v7  ;;  %v4755_v53 = vcombine.high %v9533_v15, %v9517_v31 }
 0x3c4   :  { %v5116_v32 = vadd.f32 %v7812_v30, %v4704_v27  ;;  %v5587_v22 = vsel %vm5586_vm3, %v9530_v14, -inf  ;;  %v9562_v58 = vadd.f32 %v5556_v29, %v9547_v26  ;;  %vm5767_vm9 = vcmp.lt.f32.partialorder %v9606_v42, 0.0 }
 0x3c5   :  { %v5110_v16 = vpop.f32.mrf.mxu1  ;;  %v7819_v57 = vpop.f32.mrf.mxu0  ;;  %5588 = vmax.xlane.f32.xlu0 %v5587_v22  ;;  %v9617_v22 = vld [vmem:[%s10021_s2 + $0x58] sm:$0xff]  ;;  %v4769_v1 = vrot.slane %v4755_v53, %v8221_v18 }
 0x3c6   :  { %v5203_v27 = vadd.f32 %v7819_v57, %v4705_v49  ;;  %v5559_v33 = vmul.f32 0.35355338, %v5116_v32  ;;  %v5111_v55 = vadd.f32 %v5110_v16, %v4636_v40  ;;  %v5596_v49 = vsel %vm5586_vm3, %v9542_v43, -inf  ;;  %v9627_v57 = vld [vmem:[%s10021_s2 + $0x48] sm:$0xff] }
 0x3c7   :  { %v5197_v2 = vpop.f32.mrf.mxu0  ;;  %v4762_v40 = vrot.slane %v4754_v62, %v8221_v18  ;;  %v5593_v56 = vsel %vm5586_vm3, %v9562_v58, -inf  ;;  %v4821_v32 = vrot.slane %v4807_v63, %v8221_v18  ;;  %v9655_v63 = vld [vmem:[%s10021_s2 + $0x40] sm:$0xff]  ;;  %vm5774_vm14 = vcmp.lt.f32.partialorder %v9617_v22, 0.0 }
 0x3c8   :  { %v5561_v44 = vmul.f32 0.35355338, %v5203_v27  ;;  %v5198_v34 = vadd.f32 %v5197_v2, %v4637_v11  ;;  %v9596_v20 = vadd.f32 %v5559_v33, %v9575_v41  ;;  %v5558_v47 = vmul.f32 0.35355338, %v5111_v55  ;;  %v9632_v27 = vld [vmem:[%s10021_s2 + $0x50] sm:$0xff] }
 0x3c9   :  { %5597 = vmax.xlane.f32.xlu0 %v5596_v49  ;;  %v4770_v54 = vcombine.low %v4746_v59, %v4762_v40  ;;  %v4771_v24 = vcombine.high %v4746_v59, %v4762_v40  ;;  %v4840_v33 = vcombine.low %v4821_v32, %v4837_v17  ;;  %v4841_v49 = vcombine.high %v4821_v32, %v4837_v17  ;;  %v9677_v17 = vld [vmem:[%s10021_s2 + $0x68] sm:$0xff] }
 0x3ca   :  { %v5560_v11 = vmul.f32 0.35355338, %v5198_v34  ;;  %v9590_v10 = vadd.f32 %v5561_v44, %v9559_v46  ;;  %v5602_v30 = vsel %vm5586_vm3, %v9596_v20, -inf  ;;  %v9622_v15 = vadd.f32 %v5558_v47, %v9606_v42 }
 0x3cb   :  { %v7826_v38 = vpop.f32.mrf.mxu1  ;;  %v4753_v34 = vrot.slane %v4739_v35, %v8221_v18  ;;  %vm5773_vm11 = vcmp.lt.f32.partialorder %v9632_v27, 0.0  ;;  %vm5771_vm13 = vcmp.lt.f32.partialorder %v9655_v63, 0.0  ;;  %vm5772_vm15 = vcmp.lt.f32.partialorder %v9627_v57, 0.0 }
 0x3cc   :  { %v5290_v48 = vadd.f32 %v7826_v38, %v4838_v9  ;;  %v5608_v36 = vsel %vm5586_vm3, %v9590_v10, -inf  ;;  %v9601_v23 = vadd.f32 %v5560_v11, %v9585_v51  ;;  %v5599_v45 = vsel %vm5586_vm3, %v9622_v15, -inf }
 0x3cd   :  { %5609 = vmax.xlane.f32.xlu1 %v5608_v36  ;;  %5594 = vmax.xlane.f32.xlu0 %v5593_v56  ;;  %v5284_v60 = vpop.f32.mrf.mxu1  ;;  %v7833_v6 = vpop.f32.mrf.mxu0  ;;  %v4772_v35 = vcombine.low %v4753_v34, %v4769_v1  ;;  %v4773_v56 = vcombine.high %v4753_v34, %v4769_v1  ;;  %v9662_v36 = vld [vmem:[%s10021_s2 + $0x78] sm:$0xff] }
 0x3ce   :  { %v5377_v19 = vadd.f32 %v7833_v6, %v4839_v5  ;;  %v5563_v13 = vmul.f32 0.35355338, %v5290_v48  ;;  %v5285_v50 = vadd.f32 %v5284_v60, %v4770_v54  ;;  %v5605_v31 = vsel %vm5586_vm3, %v9601_v23, -inf }
 0x3cf   :  { %v5371_v29 = vpop.f32.mrf.mxu0 }
 0x3d0   :  { %v5565_v62 = vmul.f32 0.35355338, %v5377_v19  ;;  %v5372_v16 = vadd.f32 %v5371_v29, %v4771_v24  ;;  %v5562_v55 = vmul.f32 0.35355338, %v5285_v50  ;;  %v9643_v59 = vadd.f32 %v5563_v13, %v9627_v57  ;;  %v9672_v24 = vld [vmem:[%s10021_s2 + $0x70] sm:$0xff] }
 0x3d1   :  { %5606 = vmax.xlane.f32.xlu1 %v5605_v31  ;;  %5603 = vmax.xlane.f32.xlu0 %v5602_v30  ;;  %v9695_v31 = vld [vmem:[%s10021_s2 + $0x60] sm:$0xff]  ;;  %v10058_v57 = vld [vmem:[#allocation7_spill] sm:$0xff] }
 0x3d2   :  { %v5564_v7 = vmul.f32 0.35355338, %v5372_v16  ;;  %v9635_v2 = vadd.f32 %v5565_v62, %v9617_v22  ;;  %v5614_v48 = vsel %vm5586_vm3, %v9643_v59, -inf  ;;  %v9665_v54 = vadd.f32 %v5562_v55, %v9655_v63 }
 0x3d3   :  { %v7840_v44 = vpop.f32.mrf.mxu1  ;;  %vm5775_vm2 = vcmp.lt.f32.partialorder %v9695_v31, 0.0 }
 0x3d4   :  { %v5464_v40 = vadd.f32 %v7840_v44, %v4840_v33  ;;  %v5620_v11 = vsel %vm5586_vm3, %v9635_v2, -inf  ;;  %v9650_v9 = vadd.f32 %v5564_v7, %v9632_v27  ;;  %v5611_v29 = vsel %vm5586_vm3, %v9665_v54, -inf  ;;  %v10056_v44 = vld [vmem:[#allocation5_spill] sm:$0xff] }
 0x3d5   :  { %5600 = vmax.xlane.f32.xlu0 %v5599_v45  ;;  %5621 = vmax.xlane.f32.xlu1 %v5620_v11  ;;  %v5458_v52 = vpop.f32.mrf.mxu1  ;;  %v7847_v39 = vpop.f32.mrf.mxu0 }
 0x3d6   :  { %v5551_v38 = vadd.f32 %v7847_v39, %v4841_v49  ;;  %v5567_v5 = vmul.f32 0.35355338, %v5464_v40  ;;  %v5459_v60 = vadd.f32 %v5458_v52, %v4772_v35  ;;  %v5617_v19 = vsel %vm5586_vm3, %v9650_v9, -inf }
 0x3d7   :  { %v5545_v47 = vpop.f32.mrf.mxu0 }
 0x3d8   :  { %v5569_v6 = vmul.f32 0.35355338, %v5551_v38  ;;  %v5546_v53 = vadd.f32 %v5545_v47, %v4773_v56  ;;  %v5566_v30 = vmul.f32 0.35355338, %v5459_v60  ;;  %v9690_v16 = vadd.f32 %v5567_v5, %v9677_v17 }
 0x3d9   :  { %5618 = vmax.xlane.f32.xlu1 %v5617_v19  ;;  %5615 = vmax.xlane.f32.xlu0 %v5614_v48 }
 0x3da   :  { %v5568_v13 = vmul.f32 0.35355338, %v5546_v53  ;;  %v9680_v50 = vadd.f32 %v5569_v6, %v9662_v36  ;;  %v5626_v33 = vsel %vm5586_vm3, %v9690_v16, -inf  ;;  %v9702_v1 = vadd.f32 %v5566_v30, %v9695_v31  ;;  %v10059_v31 = vld [vmem:[#allocation8_spill] sm:$0xff] }
 0x3dc   :  { %v5632_v32 = vsel %vm5586_vm3, %v9680_v50, -inf  ;;  %v9687_v62 = vadd.f32 %v5568_v13, %v9672_v24  ;;  %v5623_v55 = vsel %vm5586_vm3, %v9702_v1, -inf }
 0x3dd   :  { %5633 = vmax.xlane.f32.xlu1 %v5632_v32  ;;  %5612 = vmax.xlane.f32.xlu0 %v5611_v29 }
 0x3de   :  { %v5629_v7 = vsel %vm5586_vm3, %v9687_v62, -inf }
 0x3e1   :  { %5630 = vmax.xlane.f32.xlu1 %v5629_v7  ;;  %5627 = vmax.xlane.f32.xlu0 %v5626_v33 }
 0x3e5   :  { %5624 = vmax.xlane.f32.xlu0 %v5623_v55 }
 0x3f2   :  { %297 = vrot.lane.b32.xlu1 %v10056_v44, %s8042_s0 }
 0x3fb   :  { %285 = vrot.lane.b32.xlu0 %v10056_v44, %s8041_s8 }
 0x44c   :  { %v5592_v34 = vpop.xlane.xlu1 %5591 }
 0x44d   :  { %v5636_v49 = vsub.f32 %v9514_v4, %v5592_v34 }
 0x44e   :  { %v5589_v40 = vpop.xlane.xlu0 %5588 }
 0x44f   :  { %v5653_v45 = vmul.f32 1.442695, %v5636_v49  ;;  %v5635_v11 = vsub.f32 %v9530_v14, %v5589_v40 }
 0x451   :  { %7946 = vpow2.f32 %v5653_v45  ;;  %v5651_v52 = vmul.f32 1.442695, %v5635_v11 }
 0x452   :  { %v5598_v39 = vpop.xlane.xlu0 %5597 }
 0x453   :  { %7948 = vpow2.f32 %v5651_v52  ;;  %v5638_v35 = vsub.f32 %v9542_v43, %v5598_v39 }
 0x455   :  { %v5657_v38 = vmul.f32 1.442695, %v5638_v35 }
 0x456   :  { %v5610_v56 = vpop.xlane.xlu1 %5609  ;;  %v5595_v5 = vpop.xlane.xlu0 %5594 }
 0x457   :  { %7950 = vpow2.f32 %v5657_v38  ;;  %v5637_v47 = vsub.f32 %v9562_v58, %v5595_v5  ;;  %v5642_v43 = vsub.f32 %v9590_v10, %v5610_v56 }
 0x459   :  { %v5655_v48 = vmul.f32 1.442695, %v5637_v47  ;;  %v5665_v33 = vmul.f32 1.442695, %v5642_v43 }
 0x45a   :  { %v5607_v60 = vpop.xlane.xlu1 %5606  ;;  %v5604_v6 = vpop.xlane.xlu0 %5603 }
 0x45b   :  { %v5641_v4 = vsub.f32 %v9601_v23, %v5607_v60  ;;  %v5640_v53 = vsub.f32 %v9596_v20, %v5604_v6  ;;  %7952 = vpow2.f32 %v5655_v48 }
 0x45d   :  { %v5663_v14 = vmul.f32 1.442695, %v5641_v4  ;;  %v5661_v19 = vmul.f32 1.442695, %v5640_v53 }
 0x45e   :  { %v9716_v13 = vpop.eup %7946  ;;  %v5622_v29 = vpop.xlane.xlu1 %5621 }
 0x45f   :  { %v5601_v30 = vpop.xlane.xlu0 %5600  ;;  %7954 = vpow2.f32 %v5663_v14  ;;  %v5686_v58 = vsel %vm5586_vm3, %v9716_v13, 0.0  ;;  %v5646_v56 = vsub.f32 %v9635_v2, %v5622_v29 }
 0x460   :  { %v5639_v32 = vsub.f32 %v9622_v15, %v5601_v30  ;;  %v9722_v7 = vpop.eup %7948  ;;  %7956 = vpow2.f32 %v5661_v19  ;;  %5687 = vadd.xlane.f32.xlu1 %v5686_v58 }
 0x461   :  { %v5683_v23 = vsel %vm5586_vm3, %v9722_v7, 0.0  ;;  %v5673_v2 = vmul.f32 1.442695, %v5646_v56 }
 0x462   :  { %v5659_v20 = vmul.f32 1.442695, %v5639_v32  ;;  %v5619_v55 = vpop.xlane.xlu1 %5618  ;;  %5684 = vadd.xlane.f32.xlu0 %v5683_v23 }
 0x463   :  { %v5616_v10 = vpop.xlane.xlu0 %5615  ;;  %v5645_v34 = vsub.f32 %v9650_v9, %v5619_v55 }
 0x464   :  { %v5644_v49 = vsub.f32 %v9643_v59, %v5616_v10  ;;  %v9728_v15 = vpop.eup %7950  ;;  %7958 = vpow2.f32 %v5659_v20 }
 0x465   :  { %v5671_v40 = vmul.f32 1.442695, %v5645_v34  ;;  %v5692_v45 = vsel %vm5586_vm3, %v9728_v15, 0.0  ;;  %7960 = vpow2.f32 %v5665_v33 }
 0x466   :  { %v5669_v11 = vmul.f32 1.442695, %v5644_v49  ;;  %v5634_v52 = vpop.xlane.xlu1 %5633  ;;  %5693 = vadd.xlane.f32.xlu1 %v5692_v45 }
 0x467   :  { %v5613_v39 = vpop.xlane.xlu0 %5612  ;;  %7962 = vpow2.f32 %v5671_v40  ;;  %v5650_v35 = vsub.f32 %v9680_v50, %v5634_v52 }
 0x468   :  { %v5643_v38 = vsub.f32 %v9665_v54, %v5613_v39  ;;  %v9734_v9 = vpop.eup %7952  ;;  %7964 = vpow2.f32 %v5669_v11 }
 0x469   :  { %v5681_v59 = vmul.f32 1.442695, %v5650_v35  ;;  %v5689_v48 = vsel %vm5586_vm3, %v9734_v9, 0.0 }
 0x46a   :  { %v5667_v5 = vmul.f32 1.442695, %v5643_v38  ;;  %v5631_v47 = vpop.xlane.xlu1 %5630  ;;  %5690 = vadd.xlane.f32.xlu0 %v5689_v48 }
 0x46b   :  { %v5628_v60 = vpop.xlane.xlu0 %5627  ;;  %7966 = vpow2.f32 %v5681_v59  ;;  %v5649_v6 = vsub.f32 %v9687_v62, %v5631_v47 }
 0x46c   :  { %v9740_v4 = vpop.eup %7954  ;;  %7968 = vpow2.f32 %v5667_v5  ;;  %v5648_v14 = vsub.f32 %v9690_v16, %v5628_v60 }
 0x46d   :  { %v9742_v50 = vpop.eup %7956  ;;  %v5679_v54 = vmul.f32 1.442695, %v5649_v6  ;;  %v5701_v53 = vsel %vm5586_vm3, %v9740_v4, 0.0 }
 0x46e   :  { %5702 = vadd.xlane.f32.xlu1 %v5701_v53  ;;  %v5698_v19 = vsel %vm5586_vm3, %v9742_v50, 0.0  ;;  %v5677_v29 = vmul.f32 1.442695, %v5648_v14  ;;  %v9794_v5 = vpop.permute.xlu1 %297 }
 0x46f   :  { %7970 = vpow2.f32 %v5679_v54  ;;  %5699 = vadd.xlane.f32.xlu0 %v5698_v19  ;;  %v5625_v62 = vpop.xlane.xlu0 %5624 }
 0x470   :  { %7972 = vpow2.f32 %v5673_v2  ;;  %v5647_v30 = vsub.f32 %v9702_v1, %v5625_v62 }
 0x471   :  { %v9749_v43 = vpop.eup %7958  ;;  %7974 = vpow2.f32 %v5677_v29 }
 0x472   :  { %v5695_v32 = vsel %vm5586_vm3, %v9749_v43, 0.0  ;;  %v9754_v58 = vpop.eup %7960  ;;  %v5675_v23 = vmul.f32 1.442695, %v5647_v30 }
 0x473   :  { %5696 = vadd.xlane.f32.xlu0 %v5695_v32  ;;  %v5704_v33 = vsel %vm5586_vm3, %v9754_v58, 0.0  ;;  %v9796_v47 = vpop.permute.xlu0 %285 }
 0x474   :  { %v9756_v16 = vpop.eup %7962  ;;  %7976 = vpow2.f32 %v5675_v23 }
 0x475   :  { %v5713_v20 = vsel %vm5586_vm3, %v9756_v16, 0.0  ;;  %v9762_v55 = vpop.eup %7964 }
 0x476   :  { %5714 = vadd.xlane.f32.xlu1 %v5713_v20  ;;  %v5710_v34 = vsel %vm5586_vm3, %v9762_v55, 0.0 }
 0x477   :  { %5705 = vadd.xlane.f32.xlu0 %v5704_v33 }
 0x478   :  { %v9764_v1 = vpop.eup %7966 }
 0x479   :  { %v5728_v10 = vsel %vm5586_vm3, %v9764_v1, 0.0  ;;  %v9770_v49 = vpop.eup %7968 }
 0x47a   :  { %5729 = vadd.xlane.f32.xlu1 %v5728_v10  ;;  %v5707_v11 = vsel %vm5586_vm3, %v9770_v49, 0.0 }
 0x47b   :  { %5711 = vadd.xlane.f32.xlu0 %v5710_v34 }
 0x47c   :  { %v9772_v40 = vpop.eup %7970 }
 0x47d   :  { %v5725_v45 = vsel %vm5586_vm3, %v9772_v40, 0.0  ;;  %v9778_v52 = vpop.eup %7972 }
 0x47e   :  { %5726 = vadd.xlane.f32.xlu1 %v5725_v45  ;;  %v5716_v39 = vsel %vm5586_vm3, %v9778_v52, 0.0  ;;  %v9782_v35 = vpop.eup %7974 }
 0x47f   :  { %5708 = vadd.xlane.f32.xlu0 %v5707_v11  ;;  %v5722_v38 = vsel %vm5586_vm3, %v9782_v35, 0.0 }
 0x481   :  { %v9786_v59 = vpop.eup %7976 }
 0x482   :  { %v5719_v56 = vsel %vm5586_vm3, %v9786_v59, 0.0 }
 0x483   :  { %5717 = vadd.xlane.f32.xlu0 %v5716_v39 }
 0x487   :  { %5723 = vadd.xlane.f32.xlu0 %v5722_v38 }
 0x48b   :  { %5720 = vadd.xlane.f32.xlu0 %v5719_v56 }
 0x48f   :  { %321 = vrot.lane.b32.xlu1 %v10056_v44, %s8044_s10 }
 0x4a1   :  { %309 = vrot.lane.b32.xlu0 %v10056_v44, %s8043_s9 }
 0x4e9   :  { %v5688_v48 = vpop.xlane.xlu1 %5687 }
 0x4ea   :  { %7978 = vrcp.f32 %v5688_v48 }
 0x4eb   :  { %v5685_v60 = vpop.xlane.xlu0 %5684 }
 0x4ec   :  { %7980 = vrcp.f32 %v5685_v60 }
 0x4ef   :  { %v5694_v6 = vpop.xlane.xlu1 %5693 }
 0x4f0   :  { %7982 = vrcp.f32 %v5694_v6 }
 0x4f3   :  { %v5691_v54 = vpop.xlane.xlu0 %5690 }
 0x4f4   :  { %7984 = vrcp.f32 %v5691_v54 }
 0x4f7   :  { %v7979_v53 = vpop.eup %7978  ;;  %v5703_v2 = vpop.xlane.xlu1 %5702 }
 0x4f8   :  { %7986 = vrcp.f32 %v5703_v2  ;;  %v5700_v14 = vpop.xlane.xlu0 %5699  ;;  %v5748_v44 = vmul.f32 %v7979_v53, %v9716_v13 }
 0x4f9   :  { %v7981_v19 = vpop.eup %7980  ;;  %7988 = vrcp.f32 %v5700_v14 }
 0x4fa   :  { %v5747_v62 = vmul.f32 %v7981_v19, %v9722_v7  ;;  %v5780_v32 = vsel %vm5764_vm5, 0.0, %v5748_v44  ;;  %vm5778_vm5 = vcmp.lt.f32.partialorder %v9662_v36, 0.0 }
 0x4fc   :  { %v5697_v29 = vpop.xlane.xlu0 %5696  ;;  %v5779_v30 = vsel %vm5763_vm4, 0.0, %v5747_v62  ;;  %vm5777_vm4 = vcmp.lt.f32.partialorder %v9672_v24, 0.0 }
 0x4fd   :  { %7990 = vrcp.f32 %v5697_v29  ;;  %7852 = vmatprep.mubr.msk.f32.mxu1 %vm5586_vm3, %v5779_v30  ;;  %v7983_v20 = vpop.eup %7982 }
 0x4fe   :  { %7853 = vmatmul.mubr.msk.f32.vlgmr.msra.gmra.mxu1 %vm5586_vm3, %v5780_v32  ;;  %v5750_v13 = vmul.f32 %v7983_v20, %v9728_v15 }
 0x4ff   :  { %7856 = vmatpush3.msra.mxu1 %v9428_v28  ;;  %v5715_v23 = vpop.xlane.xlu1 %5714 }
 0x500   :  { %7992 = vrcp.f32 %v5715_v23  ;;  %7857 = vmatprep.subr.mxu1 %v9096_v61  ;;  %v5706_v21 = vpop.xlane.xlu0 %5705  ;;  %v5782_v34 = vsel %vm5766_vm7, 0.0, %v5750_v13  ;;  %vm7043_vm7 = vcmask 195584  }
 0x501   :  { %7994 = vrcp.f32 %v5706_v21  ;;  %7858 = vmatpush3.msra.mxu1 %v9096_v61  ;;  %v7985_v3 = vpop.eup %7984 }
 0x502   :  { %7869 = vmatprep.subr.mxu1 %v9087_v25  ;;  %v5749_v7 = vmul.f32 %v7985_v3, %v9734_v9 }
 0x503   :  { %v5730_v26 = vpop.xlane.xlu1 %5729 }
 0x504   :  { %v5712_v28 = vpop.xlane.xlu0 %5711  ;;  %v5781_v10 = vsel %vm5765_vm6, 0.0, %v5749_v7  ;;  %vm5776_vm6 = vcmp.lt.f32.partialorder %v9677_v17, 0.0 }
 0x505   :  { %v7987_v33 = vpop.eup %7986  ;;  %7859 = vmatprep.mubr.msk.f32.mxu1 %vm5586_vm3, %v5781_v10 }
 0x506   :  { %v5753_v61 = vmul.f32 %v7987_v33, %v9740_v4  ;;  %v7989_v45 = vpop.eup %7988  ;;  %7860 = vmatmul.mubr.msk.f32.vlgmr.msra.gmra.mxu1 %vm5586_vm3, %v5782_v34  ;;  %v10057_v4 = vld [vmem:[#allocation6_spill] sm:$0xff] }
 0x507   :  { %7870 = vmatpush3.msra.mxu1 %v9087_v25  ;;  %v5752_v51 = vmul.f32 %v7989_v45, %v9742_v50  ;;  %v5727_v48 = vpop.xlane.xlu1 %5726 }
 0x508   :  { %v5709_v15 = vpop.xlane.xlu0 %5708  ;;  %v5785_v37 = vsel %vm5769_vm8, 0.0, %v5753_v61  ;;  %7871 = vmatprep.subr.mxu1 %v9103_v0 }
 0x509   :  { %7996 = vrcp.f32 %v5709_v15  ;;  %7873 = vmatprep.mubr.msk.f32.mxu1 %vm5586_vm3, %v5785_v37  ;;  %7872 = vmatpush3.msra.mxu1 %v9103_v0  ;;  %v5784_v0 = vsel %vm5768_vm10, 0.0, %v5752_v51 }
 0x50a   :  { %v7991_v9 = vpop.eup %7990  ;;  %7883 = vmatprep.subr.mxu1 %v10057_v4  ;;  %7998 = vrcp.f32 %v5712_v28 }
 0x50b   :  { %v5751_v25 = vmul.f32 %v7991_v9, %v9749_v43  ;;  %v322_v46 = vpop.permute.xlu1 %321 }
 0x50c   :  { %v5718_v11 = vpop.xlane.xlu0 %5717 }
 0x50d   :  { %v7993_v39 = vpop.eup %7992  ;;  %v5783_v38 = vsel %vm5767_vm9, 0.0, %v5751_v25  ;;  %8000 = vrcp.f32 %v5718_v11 }
 0x50e   :  { %v7995_v56 = vpop.eup %7994  ;;  %7866 = vmatprep.mubr.msk.f32.mxu0 %vm5586_vm3, %v5783_v38  ;;  %v5757_v42 = vmul.f32 %v7993_v39, %v9756_v16  ;;  %v889_v16 = vcombine.low %v9794_v5, %v322_v46  ;;  %8002 = vrcp.f32 %v5727_v48 }
 0x50f   :  { %7867 = vmatmul.mubr.msk.f32.vlgmr.msra.gmra.mxu0 %vm5586_vm3, %v5784_v0  ;;  %v5754_v41 = vmul.f32 %v7995_v56, %v9754_v58  ;;  %v890_v58 = vcombine.high %v9794_v5, %v322_v46 }
 0x510   :  { %7877 = vmatpush3.msra.mxu0 %v9435_v8  ;;  %v5724_v50 = vpop.xlane.xlu0 %5723  ;;  %v5789_v43 = vsel %vm5773_vm11, 0.0, %v5757_v42  ;;  %v897_v63 = vrot.slane %v889_v16, %v8217_v12 }
 0x511   :  { %v5786_v60 = vsel %vm5770_vm12, 0.0, %v5754_v41  ;;  %v904_v19 = vrot.slane %v890_v58, %v8217_v12 }
 0x512   :  { %7874 = vmatmul.mubr.msk.f32.vlgmr.msra.gmra.mxu1 %vm5586_vm3, %v5786_v60 }
 0x513   :  { %7884 = vmatpush3.msra.mxu1 %v10057_v4  ;;  %7887 = vmatprep.mubr.msk.f32.mxu1 %vm5586_vm3, %v5789_v43 }
 0x514   :  { %v5721_v27 = vpop.xlane.xlu0 %5720 }
 0x515   :  { %8004 = vrcp.f32 %v5721_v27 }
 0x516   :  { %v7997_v6 = vpop.eup %7996  ;;  %8006 = vrcp.f32 %v5730_v26 }
 0x517   :  { %v5755_v8 = vmul.f32 %v7997_v6, %v9770_v49  ;;  %8008 = vrcp.f32 %v5724_v50  ;;  %v7999_v61 = vpop.eup %7998 }
 0x518   :  { %v310_v54 = vpop.permute.xlu0 %309  ;;  %v5756_v39 = vmul.f32 %v7999_v61, %v9762_v55 }
 0x519   :  { %v873_v53 = vcombine.low %v9796_v47, %v310_v54  ;;  %v874_v2 = vcombine.high %v9796_v47, %v310_v54  ;;  %v5787_v14 = vsel %vm5771_vm13, 0.0, %v5755_v8 }
 0x51a   :  { %7880 = vmatprep.mubr.msk.f32.mxu0 %vm5586_vm3, %v5787_v14  ;;  %v8001_v45 = vpop.eup %8000  ;;  %v5788_v22 = vsel %vm5772_vm15, 0.0, %v5756_v39 }
 0x51b   :  { %v881_v44 = vrot.slane %v873_v53, %v8217_v12  ;;  %v888_v5 = vrot.slane %v874_v2, %v8217_v12  ;;  %v8003_v37 = vpop.eup %8002  ;;  %v5758_v38 = vmul.f32 %v8001_v45, %v9778_v52 }
 0x51c   :  { %v5761_v50 = vmul.f32 %v8003_v37, %v9772_v40 }
 0x51d   :  { %v905_v49 = vcombine.low %v881_v44, %v897_v63  ;;  %v906_v62 = vcombine.high %v881_v44, %v897_v63  ;;  %v921_v29 = vcombine.low %v888_v5, %v904_v19  ;;  %v922_v30 = vcombine.high %v888_v5, %v904_v19 }
 0x51e   :  { %v5790_v43 = vsel %vm5774_vm14, 0.0, %v5758_v38  ;;  %v5793_v24 = vsel %vm5777_vm4, 0.0, %v5761_v50 }
 0x51f   :  { %v913_v47 = vrot.slane %v905_v49, %v8221_v18  ;;  %v920_v32 = vrot.slane %v906_v62, %v8221_v18  ;;  %v929_v20 = vrot.slane %v921_v29, %v8221_v18  ;;  %v936_v23 = vrot.slane %v922_v30, %v8221_v18 }
 0x521   :  { %v1825_v21 = vcombine.low %v913_v47, %v920_v32  ;;  %v7217_v3 = vcombine.high %v913_v47, %v920_v32  ;;  %v1841_v13 = vcombine.low %v929_v20, %v936_v23  ;;  %v7218_v7 = vcombine.high %v929_v20, %v936_v23 }
 0x522   :  { %v8005_v9 = vpop.eup %8004 }
 0x523   :  { %v1832_v28 = vrot.slane %v1825_v21, %v8217_v12  ;;  %v1840_v33 = vrot.slane %v7217_v3, %v8217_v12  ;;  %v1848_v10 = vrot.slane %v1841_v13, %v8217_v12  ;;  %v1856_v34 = vrot.slane %v7218_v7, %v8217_v12  ;;  %v8007_v56 = vpop.eup %8006 }
 0x524   :  { %v5759_v42 = vmul.f32 %v8005_v9, %v9786_v59  ;;  %v8009_v41 = vpop.eup %8008  ;;  %v5762_v60 = vmul.f32 %v8007_v56, %v9764_v1 }
 0x525   :  { %v1857_v26 = vcombine.low %v1832_v28, %v1840_v33  ;;  %v1873_v15 = vcombine.low %v1848_v10, %v1856_v34  ;;  %v1858_v25 = vcombine.high %v1832_v28, %v1840_v33  ;;  %v1874_v11 = vcombine.high %v1848_v10, %v1856_v34 }
 0x526   :  { %v5791_v40 = vsel %vm5775_vm2, 0.0, %v5759_v42  ;;  %v5760_v59 = vmul.f32 %v8009_v41, %v9782_v35  ;;  %v5794_v1 = vsel %vm5778_vm5, 0.0, %v5762_v60 }
 0x527   :  { %v1865_v51 = vrot.slane %v1857_v26, %v8221_v18  ;;  %v1881_v4 = vrot.slane %v1873_v15, %v8221_v18  ;;  %v1872_v55 = vrot.slane %v1858_v25, %v8221_v18  ;;  %v1888_v52 = vrot.slane %v1874_v11, %v8221_v18 }
 0x528   :  { %v5792_v35 = vsel %vm5776_vm6, 0.0, %v5760_v59 }
 0x529   :  { %v1889_v48 = vcombine.low %v1865_v51, %v1881_v4  ;;  %v1890_v0 = vcombine.high %v1865_v51, %v1881_v4  ;;  %v1891_v46 = vcombine.low %v1872_v55, %v1888_v52  ;;  %v1892_v27 = vcombine.high %v1872_v55, %v1888_v52 }
 0x52b   :  { %7878 = vmatprep.subr.mxu0 %v1889_v48  ;;  %7885 = vmatprep.subr.mxu1 %v1890_v0 }
 0x52c   :  { %7879 = vmatpush3.msra.mxu0 %v1889_v48  ;;  %7886 = vmatpush3.msra.mxu1 %v1890_v0  ;;  %v7051_v0 = vld [vmem:[%s10024_s5 + $0x18] sm:$0xff] }
 0x52d   :  { %7881 = vmatmul.mubr.msk.f32.vlgmr.msra.gmra.mxu0 %vm5586_vm3, %v5788_v22  ;;  %7888 = vmatmul.mubr.msk.f32.vlgmr.msra.gmra.mxu1 %vm5586_vm3, %v5790_v43 }
 0x52e   :  { %7890 = vmatprep.subr.mxu0 %v10058_v57  ;;  %7897 = vmatprep.subr.mxu1 %v10059_v31 }
 0x52f   :  { %7891 = vmatpush3.msra.mxu0 %v10058_v57  ;;  %7894 = vmatprep.mubr.msk.f32.mxu0 %vm5586_vm3, %v5791_v40 }
 0x530   :  { %7898 = vmatpush3.msra.mxu1 %v10059_v31  ;;  %7901 = vmatprep.mubr.msk.f32.mxu1 %vm5586_vm3, %v5793_v24  ;;  %v7050_v24 = vld [vmem:[%s10024_s5 + $0x10] sm:$0xff] }
 0x531   :  { %7892 = vmatprep.subr.mxu0 %v1891_v46  ;;  %7899 = vmatprep.subr.mxu1 %v1892_v27 }
 0x532   :  { %7893 = vmatpush3.msra.mxu0 %v1891_v46  ;;  %7900 = vmatpush3.msra.mxu1 %v1892_v27 }
 0x533   :  { %7895 = vmatmul.mubr.msk.f32.vlgmr.msra.gmra.mxu0 %vm5586_vm3, %v5792_v35  ;;  %7902 = vmatmul.mubr.msk.f32.vlgmr.msra.gmra.mxu1 %vm5586_vm3, %v5794_v1 }
 0x534   :  { %7904 = vmatprep.subr.mxu0 %v7051_v0 }
 0x535   :  { %7905 = vmatpush3.msra.mxu0 %v7051_v0 }
 0x536   :  { %7906 = vmatprep.subr.mxu0 %v7050_v24 }
 0x537   :  { %7907 = vmatpush3.msra.mxu0 %v7050_v24 }
 0x5be   :  { %v7854_v17 = vpop.f32.mrf.mxu1 }
 0x5c0   :  { %v5867_v6 = vpop.f32.mrf.mxu1 }
 0x5c6   :  { %v7861_v16 = vpop.f32.mrf.mxu1 }
 0x5c8   :  { %v5948_v8 = vpop.f32.mrf.mxu1 }
 0x5cf   :  { %v7868_v58 = vpop.f32.mrf.mxu0 }
 0x5d0   :  { %v6511_v54 = vcombine.low %v7854_v17, %v7868_v58  ;;  %v6512_v53 = vcombine.high %v7854_v17, %v7868_v58  ;;  %v7049_v17 = vld [vmem:[%s10024_s5 + $0x8] sm:$0xff] }
 0x5d1   :  { %v6029_v2 = vpop.f32.mrf.mxu0  ;;  %7908 = vmatprep.subr.mxu0 %v7049_v17 }
 0x5d2   :  { %v7875_v14 = vpop.f32.mrf.mxu1  ;;  %v6519_v44 = vrot.slane %v6511_v54, %v8217_v12  ;;  %v6526_v36 = vrot.slane %v6512_v53, %v8217_v12  ;;  %v6443_v5 = vcombine.low %v5867_v6, %v6029_v2  ;;  %v6444_v49 = vcombine.high %v5867_v6, %v6029_v2  ;;  %7909 = vmatpush3.msra.mxu0 %v7049_v17 }
 0x5d3   :  { %v6527_v63 = vcombine.low %v7861_v16, %v7875_v14  ;;  %v6528_v19 = vcombine.high %v7861_v16, %v7875_v14 }
 0x5d4   :  { %v6110_v62 = vpop.f32.mrf.mxu1  ;;  %v6451_v13 = vrot.slane %v6443_v5, %v8217_v12  ;;  %v6458_v7 = vrot.slane %v6444_v49, %v8217_v12 }
 0x5d5   :  { %v6535_v29 = vrot.slane %v6527_v63, %v8217_v12  ;;  %v6542_v30 = vrot.slane %v6528_v19, %v8217_v12  ;;  %v6459_v47 = vcombine.low %v5948_v8, %v6110_v62  ;;  %v6460_v32 = vcombine.high %v5948_v8, %v6110_v62 }
 0x5d7   :  { %v6543_v20 = vcombine.low %v6519_v44, %v6535_v29  ;;  %v6544_v23 = vcombine.high %v6519_v44, %v6535_v29  ;;  %v6559_v21 = vcombine.low %v6526_v36, %v6542_v30  ;;  %v6560_v3 = vcombine.high %v6526_v36, %v6542_v30  ;;  %v7048_v44 = vld [vmem:[%s10024_s5] sm:$0xff]  ;;  %s8048_s5 = smov 16  }
 0x5d8   :  { %v6467_v28 = vrot.slane %v6459_v47, %v8217_v12  ;;  %v6474_v33 = vrot.slane %v6460_v32, %v8217_v12  ;;  %7910 = vmatprep.subr.mxu0 %v7048_v44 }
 0x5d9   :  { %v6551_v10 = vrot.slane %v6543_v20, %v8221_v18  ;;  %v6558_v34 = vrot.slane %v6544_v23, %v8221_v18  ;;  %v6567_v61 = vrot.slane %v6559_v21, %v8221_v18  ;;  %v6574_v45 = vrot.slane %v6560_v3, %v8221_v18  ;;  %7911 = vmatpush3.msra.mxu0 %v7048_v44 }
 0x5da   :  { %v6475_v26 = vcombine.low %v6451_v13, %v6467_v28  ;;  %v6476_v15 = vcombine.high %v6451_v13, %v6467_v28  ;;  %v6491_v37 = vcombine.low %v6458_v7, %v6474_v33  ;;  %v6492_v9 = vcombine.high %v6458_v7, %v6474_v33 }
 0x5db   :  { %v6783_v51 = vcombine.low %v6551_v10, %v6558_v34  ;;  %v7367_v4 = vcombine.high %v6551_v10, %v6558_v34  ;;  %v6799_v25 = vcombine.low %v6567_v61, %v6574_v45  ;;  %v7368_v11 = vcombine.high %v6567_v61, %v6574_v45 }
 0x5dc   :  { %v6483_v39 = vrot.slane %v6475_v26, %v8221_v18  ;;  %v6490_v38 = vrot.slane %v6476_v15, %v8221_v18  ;;  %v6499_v56 = vrot.slane %v6491_v37, %v8221_v18  ;;  %v6506_v48 = vrot.slane %v6492_v9, %v8221_v18 }
 0x5dd   :  { %v6790_v42 = vrot.slane %v6783_v51, %v8217_v12  ;;  %v6798_v41 = vrot.slane %v7367_v4, %v8217_v12  ;;  %v6806_v50 = vrot.slane %v6799_v25, %v8217_v12  ;;  %v6814_v55 = vrot.slane %v7368_v11, %v8217_v12 }
 0x5de   :  { %v6715_v52 = vcombine.low %v6483_v39, %v6490_v38  ;;  %v7365_v22 = vcombine.high %v6483_v39, %v6490_v38  ;;  %v6731_v43 = vcombine.low %v6499_v56, %v6506_v48  ;;  %v7366_v57 = vcombine.high %v6499_v56, %v6506_v48 }
 0x5df   :  { %v6815_v31 = vcombine.low %v6790_v42, %v6798_v41  ;;  %v6831_v40 = vcombine.low %v6806_v50, %v6814_v55  ;;  %v6816_v59 = vcombine.high %v6790_v42, %v6798_v41  ;;  %v6832_v60 = vcombine.high %v6806_v50, %v6814_v55 }
 0x5e0   :  { %v6722_v46 = vrot.slane %v6715_v52, %v8217_v12  ;;  %v6730_v27 = vrot.slane %v7365_v22, %v8217_v12  ;;  %v6738_v35 = vrot.slane %v6731_v43, %v8217_v12  ;;  %v6746_v1 = vrot.slane %v7366_v57, %v8217_v12 }
 0x5e1   :  { %v9916_v6 = vrot.slane %v6815_v31, %v8221_v18  ;;  %v9919_v16 = vrot.slane %v6831_v40, %v8221_v18  ;;  %v6830_v14 = vrot.slane %v6816_v59, %v8221_v18  ;;  %v6846_v63 = vrot.slane %v6832_v60, %v8221_v18 }
 0x5e2   :  { %v6747_v58 = vcombine.low %v6722_v46, %v6730_v27  ;;  %v6763_v8 = vcombine.low %v6738_v35, %v6746_v1  ;;  %v6748_v54 = vcombine.high %v6722_v46, %v6730_v27  ;;  %v6764_v53 = vcombine.high %v6738_v35, %v6746_v1 }
 0x5e3   :  { %v6848_v2 = vcombine.high %v9916_v6, %v9919_v16  ;;  %v6847_v19 = vcombine.low %v9916_v6, %v9919_v16  ;;  %v6849_v47 = vcombine.low %v6830_v14, %v6846_v63  ;;  %v6850_v20 = vcombine.high %v6830_v14, %v6846_v63 }
 0x5e4   :  { %v9931_v36 = vrot.slane %v6747_v58, %v8221_v18  ;;  %v9934_v5 = vrot.slane %v6763_v8, %v8221_v18  ;;  %v6762_v62 = vrot.slane %v6748_v54, %v8221_v18  ;;  %v6778_v29 = vrot.slane %v6764_v53, %v8221_v18 }
 0x5e5   :  { %6993 = vrot.lane.b32.xlu1 %v6848_v2, %s8047_s30 }
 0x5e6   :  { %v6780_v49 = vcombine.high %v9931_v36, %v9934_v5  ;;  %v6779_v30 = vcombine.low %v9931_v36, %v9934_v5  ;;  %v6781_v32 = vcombine.low %v6762_v62, %v6778_v29  ;;  %v6782_v3 = vcombine.high %v6762_v62, %v6778_v29 }
 0x5e8   :  { %6991 = vrot.lane.b32.xlu0 %v6780_v49, %s8047_s30 }
 0x5e9   :  { %7009 = vrot.lane.b32.xlu1 %v6849_v47, %s8048_s5 }
 0x5ec   :  { %7007 = vrot.lane.b32.xlu0 %v6781_v32, %s8048_s5 }
 0x5ed   :  { %7025 = vrot.lane.b32.xlu1 %v6850_v20, %s8049_s11  ;;  %v7882_v23 = vpop.f32.mrf.mxu0  ;;  %v7889_v21 = vpop.f32.mrf.mxu1 }
 0x5ef   :  { %v6191_v13 = vpop.f32.mrf.mxu0  ;;  %v6272_v7 = vpop.f32.mrf.mxu1 }
 0x5f0   :  { %7023 = vrot.lane.b32.xlu0 %v6782_v3, %s8049_s11 }
 0x5f3   :  { %v7896_v28 = vpop.f32.mrf.mxu0  ;;  %v7903_v33 = vpop.f32.mrf.mxu1 }
 0x5f4   :  { %v6647_v10 = vcombine.low %v7882_v23, %v7896_v28  ;;  %v6648_v34 = vcombine.high %v7882_v23, %v7896_v28  ;;  %v6663_v61 = vcombine.low %v7889_v21, %v7903_v33  ;;  %v6664_v45 = vcombine.high %v7889_v21, %v7903_v33 }
 0x5f5   :  { %v6353_v26 = vpop.f32.mrf.mxu0  ;;  %v6434_v15 = vpop.f32.mrf.mxu1 }
 0x5f6   :  { %v6655_v37 = vrot.slane %v6647_v10, %v8217_v12  ;;  %v6662_v9 = vrot.slane %v6648_v34, %v8217_v12  ;;  %v6671_v51 = vrot.slane %v6663_v61, %v8217_v12  ;;  %v6678_v4 = vrot.slane %v6664_v45, %v8217_v12 }
 0x5f7   :  { %v6579_v25 = vcombine.low %v6191_v13, %v6353_v26  ;;  %v6580_v11 = vcombine.high %v6191_v13, %v6353_v26  ;;  %v6595_v39 = vcombine.low %v6272_v7, %v6434_v15  ;;  %v6596_v38 = vcombine.high %v6272_v7, %v6434_v15 }
 0x5f8   :  { %v6679_v56 = vcombine.low %v6655_v37, %v6671_v51  ;;  %v6680_v48 = vcombine.high %v6655_v37, %v6671_v51  ;;  %v6695_v0 = vcombine.low %v6662_v9, %v6678_v4  ;;  %v6696_v42 = vcombine.high %v6662_v9, %v6678_v4 }
 0x5f9   :  { %v6587_v41 = vrot.slane %v6579_v25, %v8217_v12  ;;  %v6594_v50 = vrot.slane %v6580_v11, %v8217_v12  ;;  %v6603_v55 = vrot.slane %v6595_v39, %v8217_v12  ;;  %v6610_v52 = vrot.slane %v6596_v38, %v8217_v12 }
 0x5fa   :  { %v6687_v22 = vrot.slane %v6679_v56, %v8221_v18  ;;  %v6694_v43 = vrot.slane %v6680_v48, %v8221_v18  ;;  %v6703_v57 = vrot.slane %v6695_v0, %v8221_v18  ;;  %v6710_v31 = vrot.slane %v6696_v42, %v8221_v18 }
 0x5fb   :  { %v6611_v40 = vcombine.low %v6587_v41, %v6603_v55  ;;  %v6612_v59 = vcombine.high %v6587_v41, %v6603_v55  ;;  %v6627_v60 = vcombine.low %v6594_v50, %v6610_v52  ;;  %v6628_v24 = vcombine.high %v6594_v50, %v6610_v52 }
 0x5fc   :  { %v6919_v46 = vcombine.low %v6687_v22, %v6694_v43  ;;  %v7371_v27 = vcombine.high %v6687_v22, %v6694_v43  ;;  %v6935_v35 = vcombine.low %v6703_v57, %v6710_v31  ;;  %v7372_v1 = vcombine.high %v6703_v57, %v6710_v31 }
 0x5fd   :  { %v6619_v17 = vrot.slane %v6611_v40, %v8221_v18  ;;  %v6626_v58 = vrot.slane %v6612_v59, %v8221_v18  ;;  %v6635_v8 = vrot.slane %v6627_v60, %v8221_v18  ;;  %v6642_v54 = vrot.slane %v6628_v24, %v8221_v18 }
 0x5fe   :  { %v6926_v53 = vrot.slane %v6919_v46, %v8217_v12  ;;  %v6934_v2 = vrot.slane %v7371_v27, %v8217_v12  ;;  %v6942_v14 = vrot.slane %v6935_v35, %v8217_v12  ;;  %v6950_v63 = vrot.slane %v7372_v1, %v8217_v12 }
 0x5ff   :  { %v6851_v44 = vcombine.low %v6619_v17, %v6626_v58  ;;  %v7369_v49 = vcombine.high %v6619_v17, %v6626_v58  ;;  %v6867_v62 = vcombine.low %v6635_v8, %v6642_v54  ;;  %v7370_v29 = vcombine.high %v6635_v8, %v6642_v54  ;;  %v7373_v17 = vld [vmem:[%s10025_s6] ss:$0 sm:$0xff]  ;;  %s8010_s6 = scalar_lea.vmem %s7166_s15, 512 }
 0x600   :  { %v6951_v47 = vcombine.low %v6926_v53, %v6934_v2  ;;  %v6967_v32 = vcombine.low %v6942_v14, %v6950_v63  ;;  %v6952_v20 = vcombine.high %v6926_v53, %v6934_v2  ;;  %v6968_v23 = vcombine.high %v6942_v14, %v6950_v63  ;;  %p8011_p0 = scmp.ne.s32.totalorder %s7166_s15, %s8010_s6  ;;  %p8016_p2 = scmp.lt.s32.totalorder %s8010_s6, %s8010_s6 }
 0x601   :  { %v6858_v21 = vrot.slane %v6851_v44, %v8217_v12  ;;  %v6866_v3 = vrot.slane %v7369_v49, %v8217_v12  ;;  %v6874_v13 = vrot.slane %v6867_v62, %v8217_v12  ;;  %v6882_v7 = vrot.slane %v7370_v29, %v8217_v12 }
 0x602   :  { %v6959_v28 = vrot.slane %v6951_v47, %v8221_v18  ;;  %v6975_v33 = vrot.slane %v6967_v32, %v8221_v18  ;;  %v6966_v15 = vrot.slane %v6952_v20, %v8221_v18  ;;  %v6982_v37 = vrot.slane %v6968_v23, %v8221_v18  ;;  %p8017_p3 = por %p8016_p2, %p8015_p1 }
 0x603   :  { %v6883_v10 = vcombine.low %v6858_v21, %v6866_v3  ;;  %v6899_v34 = vcombine.low %v6874_v13, %v6882_v7  ;;  %v6884_v61 = vcombine.high %v6858_v21, %v6866_v3  ;;  %v6900_v45 = vcombine.high %v6874_v13, %v6882_v7 }
 0x604   :  { %v6984_v26 = vcombine.high %v6959_v28, %v6975_v33  ;;  %v6983_v9 = vcombine.low %v6959_v28, %v6975_v33  ;;  %v6985_v38 = vcombine.low %v6966_v15, %v6982_v37  ;;  %v6986_v48 = vcombine.high %v6966_v15, %v6982_v37  ;;  %p8018_p4 = pnand %p8017_p3, %p8011_p0 }
 0x605   :  { %v6891_v51 = vrot.slane %v6883_v10, %v8221_v18  ;;  %v6907_v4 = vrot.slane %v6899_v34, %v8221_v18  ;;  %v6898_v25 = vrot.slane %v6884_v61, %v8221_v18  ;;  %v6914_v11 = vrot.slane %v6900_v45, %v8221_v18 }
 0x606   :  { %6997 = vrot.lane.b32.xlu1 %v6984_v26, %s8047_s30 }
 0x607   :  { %v6916_v12 = vcombine.high %v6891_v51, %v6907_v4  ;;  %v6915_v39 = vcombine.low %v6891_v51, %v6907_v4  ;;  %v6917_v56 = vcombine.low %v6898_v25, %v6914_v11  ;;  %v6918_v0 = vcombine.high %v6898_v25, %v6914_v11 }
 0x609   :  { %6995 = vrot.lane.b32.xlu0 %v6916_v12, %s8047_s30 }
 0x60a   :  { %7013 = vrot.lane.b32.xlu1 %v6985_v38, %s8048_s5 }
 0x60d   :  { %7011 = vrot.lane.b32.xlu0 %v6917_v56, %s8048_s5 }
 0x60e   :  { %7029 = vrot.lane.b32.xlu1 %v6986_v48, %s8049_s11 }
 0x611   :  { %7027 = vrot.lane.b32.xlu0 %v6918_v0, %s8049_s11 }
 0x657   :  { %v6994_v42 = vpop.permute.xlu1 %6993 }
 0x658   :  { %v7036_v22 = vsel %vm2041_vm1, %v6847_v19, %v6994_v42 }
 0x65a   :  { %v6992_v41 = vpop.permute.xlu0 %6991 }
 0x65b   :  { %v7010_v50 = vpop.permute.xlu1 %7009  ;;  %v7035_v18 = vsel %vm2041_vm1, %v6779_v30, %v6992_v41 }
 0x65c   :  { %v7040_v31 = vsel %vm5586_vm3, %v7036_v22, %v7010_v50 }
 0x65e   :  { %v7008_v55 = vpop.permute.xlu0 %7007 }
 0x65f   :  { %v7026_v52 = vpop.permute.xlu1 %7025  ;;  %v7039_v43 = vsel %vm5586_vm3, %v7035_v18, %v7008_v55 }
 0x660   :  { %v7045_v59 = vsel %vm7043_vm7, %v7040_v31, %v7026_v52 }
 0x662   :  { %v7024_v57 = vpop.permute.xlu0 %7023 }
 0x663   :  { %v7044_v40 = vsel %vm7043_vm7, %v7039_v43, %v7024_v57 }
 0x664   :  { %7912 = vmatprep.mubr.msk.f32.mxu0 %vm31_vm0, %v7044_v40 }
 0x665   :  { %7913 = vmatmul.mubr.msk.f32.vlgmr.msra.gmra.mxu0 %vm31_vm0, %v7045_v59 }
 0x678   :  { %v6998_v36 = vpop.permute.xlu1 %6997 }
 0x679   :  { %v7038_v19 = vsel %vm2041_vm1, %v6983_v9, %v6998_v36 }
 0x67b   :  { %v6996_v5 = vpop.permute.xlu0 %6995 }
 0x67c   :  { %v7014_v30 = vpop.permute.xlu1 %7013  ;;  %v7037_v6 = vsel %vm2041_vm1, %v6915_v39, %v6996_v5 }
 0x67d   :  { %v7042_v27 = vsel %vm5586_vm3, %v7038_v19, %v7014_v30 }
 0x67f   :  { %v7012_v60 = vpop.permute.xlu0 %7011 }
 0x680   :  { %v7030_v16 = vpop.permute.xlu1 %7029  ;;  %v7041_v24 = vsel %vm5586_vm3, %v7037_v6, %v7012_v60 }
 0x681   :  { %v7047_v1 = vsel %vm7043_vm7, %v7042_v27, %v7030_v16 }
 0x683   :  { %v7028_v46 = vpop.permute.xlu0 %7027 }
 0x684   :  { %v7046_v35 = vsel %vm7043_vm7, %v7041_v24, %v7028_v46 }
 0x685   :  { %7915 = vmatprep.mubr.msk.f32.mxu0 %vm31_vm0, %v7046_v35 }
 0x686   :  { %7916 = vmatmul.mubr.msk.f32.gmra.mxu0 %vm31_vm0, %v7047_v1 }
 0x725   :  { %v7914_v58 = vpop.f32.mrf.mxu0 }
 0x726   :  { %v7143_v8 = vadd.f32 %v7914_v58, %v7373_v17 }
 0x727   :  { %v7137_v54 = vpop.f32.mrf.mxu0 }
 0x728   :  { %7157 = vst.msk [vmem:[#allocation2 + $0x8] sm:$0xff] %vm31_vm0, %v7143_v8  ;;  %v7138_v53 = vadd.f32 %v7373_v17, %v7137_v54 }
 0x72a   :  { %7156 = vst.msk [vmem:[#allocation2] sm:$0xff] %vm31_vm0, %v7138_v53 }
 0x746   :  { %v7917_v2 = vpop.f32.mrf.mxu0 }
 0x747   :  { %v7153_v14 = vadd.f32 %v7917_v2, %v7373_v17 }
 0x748   :  { %v7147_v63 = vpop.f32.mrf.mxu0 }
 0x749   :  { %7159 = vst.msk [vmem:[#allocation2 + $0x18] sm:$0xff] %vm31_vm0, %v7153_v14  ;;  %v7148_v44 = vadd.f32 %v7373_v17, %v7147_v63 }
 0x74b   :  { %7158 = vst.msk [vmem:[#allocation2 + $0x10] sm:$0xff] %vm31_vm0, %v7148_v44 }
 0x74c   :  { %8021 = shalt.err (!%p8018_p4)
}
 0x74d   :  { %s8051_s3 = smov 128  }
 0x74e   :  { %7171 = dma.vmem_to_hbm [thread:$0]  %s7166_s15, 512, %s10026_s7, [#allocation3], %s8051_s3, %s8051_s3, %s8047_s30  }
 0x74f   :  { %8030 = dma.done.wait [#allocation3], 512  }
 0x750   :  { %8031 = vsyncadd [#allocation3], 4294966784 }
 0x751   :  { %7175 = vsyncpa [#allocation3], 1 }

</bundles_post_ra>
